<compile_context>
chip_gen: v7x
topology: tpu7x:2x2x1
jax: 0.10.0
libtpu: 0.0.40
codegen_flags: <defaults>
</compile_context>

<pallas_src>
import math
from functools import partial

import jax
import jax.numpy as jnp
from jax.experimental import pallas as pl
from jax.experimental.pallas import tpu as pltpu


# ---------------------------------------------------------------------------
# shared math (used inside the Pallas kernel and by the pure-JAX reference)
# ---------------------------------------------------------------------------
def _layer_norm(x, ln, eps=1e-5):
    gamma, beta = ln[0:1, :], ln[1:2, :]                      # (1, E) each
    mu = jnp.mean(x, axis=-1, keepdims=True)
    var = jnp.mean((x - mu) ** 2, axis=-1, keepdims=True)
    return (x - mu) * jax.lax.rsqrt(var + eps) * gamma + beta


def _causal_bias(s_q, s_k):
    qi = jax.lax.broadcasted_iota(jnp.int32, (s_q, s_k), 0)
    ki = jax.lax.broadcasted_iota(jnp.int32, (s_q, s_k), 1)
    return jnp.where(qi >= ki, 0.0, -1e30).astype(jnp.float32)


def _split_heads(x2, n_rows, s, num_heads, head_dim):
    """(n_rows*s, E) -> (n_rows*num_heads, s, head_dim) using only static slices."""
    parts = []
    for b in range(n_rows):
        xb = x2[b * s:(b + 1) * s]
        for h in range(num_heads):
            parts.append(xb[:, h * head_dim:(h + 1) * head_dim][None])
    return parts[0] if len(parts) == 1 else jnp.concatenate(parts, axis=0)


def _merge_heads(ctx, n_rows, num_heads):
    """(n_rows*num_heads, s, head_dim) -> (n_rows*s, E)."""
    rows = []
    for b in range(n_rows):
        heads = [ctx[b * num_heads + h] for h in range(num_heads)]
        rows.append(heads[0] if num_heads == 1 else jnp.concatenate(heads, axis=-1))
    return rows[0] if n_rows == 1 else jnp.concatenate(rows, axis=0)


def _mha(q_src, kv_src, w, b, n_rows, s_q, s_k, num_heads, head_dim, causal, recip):
    """Multi-head attention with lane-dense projections.

    q_src: (n_rows*s_q, E)   kv_src: (n_rows*s_k, E)
    w: (4, E, E) bf16 = [Wq*scale | Wk | Wv | Wo]   b: (4, 1, E) f32 (scale folded in bq)
    """
    bf16 = jnp.bfloat16
    # lane-dense (M, E) @ (E, E) projections with f32 MXU accumulation
    q = jnp.dot(q_src.astype(bf16), w[0], preferred_element_type=jnp.float32) + b[0]
    k = jnp.dot(kv_src.astype(bf16), w[1], preferred_element_type=jnp.float32) + b[1]
    v = jnp.dot(kv_src.astype(bf16), w[2], preferred_element_type=jnp.float32) + b[2]

    qh = _split_heads(q, n_rows, s_q, num_heads, head_dim).astype(bf16)   # (BH, Sq, Dh)
    kh = _split_heads(k, n_rows, s_k, num_heads, head_dim).astype(bf16)   # (BH, Sk, Dh)
    vh = _split_heads(v, n_rows, s_k, num_heads, head_dim).astype(bf16)

    scores = jnp.einsum('bqd,bkd->bqk', qh, kh,
                        preferred_element_type=jnp.float32)               # (BH, Sq, Sk)
    if causal:
        scores = scores + _causal_bias(s_q, s_k)[None]                    # mask built once
    scores = scores - jnp.max(scores, axis=-1, keepdims=True)
    p = jnp.exp(scores)
    p = p * recip(jnp.sum(p, axis=-1, keepdims=True))

    ctx = jnp.einsum('bqk,bkd->bqd', p.astype(bf16), vh,
                     preferred_element_type=jnp.float32)                  # (BH, Sq, Dh)
    ctx2 = _merge_heads(ctx, n_rows, num_heads)                           # (B*Sq, E)
    # ONE lane-dense output projection
    return jnp.dot(ctx2.astype(bf16), w[3], preferred_element_type=jnp.float32) + b[3]


def _decoder_layer(x2, enc2, lp, n_rows, s_q, s_k, num_heads, head_dim, recip):
    """One DecoderLayer on flattened activations x2: (n_rows*s_q, E)."""
    bf16 = jnp.bfloat16
    # masked (causal) self-attention + residual + layer_norm_1
    attn = _mha(x2, x2, lp["sa_w"], lp["sa_b"], n_rows, s_q, s_q,
                num_heads, head_dim, True, recip)
    x2 = _layer_norm(attn + x2, lp["ln1"])
    # cross-attention (queries from decoder, keys/values from encoder output)
    cross = _mha(x2, enc2, lp["ca_w"], lp["ca_b"], n_rows, s_q, s_k,
                 num_heads, head_dim, False, recip)
    x2 = _layer_norm(cross + x2, lp["ln2"])
    # feed-forward + residual + layer_norm_2 (same params, as in the PyTorch module)
    h = jnp.maximum(jnp.dot(x2.astype(bf16), lp["ff_w1"],
                            preferred_element_type=jnp.float32) + lp["ff_b1"], 0.0)
    y = jnp.dot(h.astype(bf16), lp["ff_w2"],
                preferred_element_type=jnp.float32) + lp["ff_b2"]
    return _layer_norm(y + x2, lp["ln2"])


# ---------------------------------------------------------------------------
# Pallas kernel: grid = (batch_tile, layer); activations carried in VMEM scratch
# ---------------------------------------------------------------------------
def _decoder_stack_kernel(x_ref, enc_ref,
                          sa_w_ref, sa_b_ref, ln1_ref,
                          ca_w_ref, ca_b_ref, ln2_ref,
                          ff_w1_ref, ff_b1_ref, ff_w2_ref, ff_b2_ref,
                          out_ref, x_scr, *, num_heads, head_dim, batch_tile, s_q, s_k):
    layer = pl.program_id(1)

    @pl.when(layer == 0)
    def _():                               # fresh activations for this batch tile
        x_scr[...] = x_ref[...]

    lp = dict(
        sa_w=sa_w_ref[...], sa_b=sa_b_ref[...], ln1=ln1_ref[...],
        ca_w=ca_w_ref[...], ca_b=ca_b_ref[...], ln2=ln2_ref[...],
        ff_w1=ff_w1_ref[...], ff_b1=ff_b1_ref[...],
        ff_w2=ff_w2_ref[...], ff_b2=ff_b2_ref[...],
    )
    y = _decoder_layer(x_scr[...], enc_ref[...], lp, batch_tile, s_q, s_k,
                       num_heads, head_dim,
                       lambda d: pl.reciprocal(d, approx=True))
    x_scr[...] = y                         # carry activations to the next layer

    @pl.when(layer == pl.num_programs(1) - 1)
    def _():
        out_ref[...] = y.astype(out_ref.dtype)


def decoder_stack_pallas(x, enc, sp, num_heads, batch_tile=None):
    B, S, E = x.shape
    Se = enc.shape[1]
    H = num_heads
    Dh = E // H
    F = sp["ff_w1"].shape[-1]
    L = sp["ln1"].shape[0]

    if batch_tile is None:                 # largest small divisor of B -> weight reuse
        batch_tile = next(t for t in (8, 4, 2, 1) if B % t == 0)
    TB = batch_tile
    assert B % TB == 0

    # host-side layout plumbing: flatten (batch, seq) so the kernel only sees 2-D
    # activation slabs; cast the (read-only) encoder output to bf16 ONCE.
    x2 = x.reshape(B * S, E)
    enc2 = enc.astype(jnp.bfloat16).reshape(B * Se, E)

    act = lambda b, l: (b, 0)              # x / enc / out: per batch tile, const over layers
    w3 = lambda b, l: (l, 0, 0)            # per-layer rank-3 params
    w4 = lambda b, l: (l, 0, 0, 0)         # per-layer rank-4 params

    # rough VMEM budget: 2x (double-buffer) bf16 weights + activations + scores
    weight_bytes = 2 * (8 * E * E + 2 * E * F)
    act_bytes = TB * (3 * S * E * 4 + Se * E * 2) + TB * H * S * max(S, Se) * 4
    vmem_limit = int(min(max(3 * weight_bytes + 2 * act_bytes + (8 << 20), 32 << 20),
                         64 << 20))        # stay within v7x's 64 MiB / TC
    # TODO(synk): split the FFN over F (third grid axis) and KV-chunk the attention
    # for production E/F/S; use CORE_PARALLEL on the batch axis for v7x.

    kernel = partial(_decoder_stack_kernel, num_heads=H, head_dim=Dh,
                     batch_tile=TB, s_q=S, s_k=Se)
    out = pl.pallas_call(
        kernel,
        out_shape=jax.ShapeDtypeStruct((B * S, E), jnp.float32),
        grid_spec=pltpu.PrefetchScalarGridSpec(
            num_scalar_prefetch=0,
            grid=(B // TB, L),                                # layer axis innermost
            in_specs=[
                pl.BlockSpec((TB * S, E), act),               # x (flattened rows)
                pl.BlockSpec((TB * Se, E), act),              # encoder output (bf16)
                pl.BlockSpec((None, 4, E, E), w4),            # self-attn [Wq|Wk|Wv|Wo]
                pl.BlockSpec((None, 4, 1, E), w4),            # self-attn biases
                pl.BlockSpec((None, 2, E), w3),               # layer_norm_1 gamma/beta
                pl.BlockSpec((None, 4, E, E), w4),            # cross-attn [Wq|Wk|Wv|Wo]
                pl.BlockSpec((None, 4, 1, E), w4),            # cross-attn biases
                pl.BlockSpec((None, 2, E), w3),               # layer_norm_2 gamma/beta
                pl.BlockSpec((None, E, F), w3),               # ff W1
                pl.BlockSpec((None, 1, F), w3),               # ff b1
                pl.BlockSpec((None, F, E), w3),               # ff W2
                pl.BlockSpec((None, 1, E), w3),               # ff b2
            ],
            out_specs=pl.BlockSpec((TB * S, E), act),
            scratch_shapes=[pltpu.VMEM((TB * S, E), jnp.float32)],
        ),
        compiler_params=pltpu.CompilerParams(
            dimension_semantics=("parallel", "arbitrary"),
            vmem_limit_bytes=vmem_limit),
    )(x2, enc2,
      sp["sa_w"], sp["sa_b"], sp["ln1"],
      sp["ca_w"], sp["ca_b"], sp["ln2"],
      sp["ff_w1"], sp["ff_b1"], sp["ff_w2"], sp["ff_b2"])
    return out.reshape(B, S, E)


def decoder_forward(x, decoder_padding_mask, encoder_output, out_encoder_mask_keys,
                    stacked_params, num_heads):
    """Mirrors Decoder.forward; the whole layer stack runs in one pallas_call."""
    del decoder_padding_mask, out_encoder_mask_keys  # TODO(synk): see note at top
    return decoder_stack_pallas(x, encoder_output, stacked_params, num_heads)


# ---------------------------------------------------------------------------
# parameter construction: PyTorch-style per-layer weights -> fused kernel layout
# ---------------------------------------------------------------------------
def init_decoder_params(key, num_layers, E, H, F):
    params = []
    for _ in range(num_layers):
        key, k0, k1, k2, k3, k4, k5, k6, k7 = jax.random.split(key, 9)
        params.append({
            "num_heads": H,
            "sa_w": 0.02 * jax.random.normal(k0, (4, E, E), jnp.float32),
            "sa_b": 0.01 * jax.random.normal(k1, (4, E), jnp.float32),
            "ca_w": 0.02 * jax.random.normal(k2, (4, E, E), jnp.float32),
            "ca_b": 0.01 * jax.random.normal(k3, (4, E), jnp.float32),
            "ln1": jnp.stack([jnp.ones((E,), jnp.float32), jnp.zeros((E,), jnp.float32)]),
            "ln2": jnp.stack([jnp.ones((E,), jnp.float32), jnp.zeros((E,), jnp.float32)]),
            "ff_w1": 0.02 * jax.random.normal(k4, (E, F), jnp.float32),
            "ff_b1": 0.01 * jax.random.normal(k5, (1, F), jnp.float32),
            "ff_w2": 0.02 * jax.random.normal(k6, (F, E), jnp.float32),
            "ff_b2": 0.01 * jax.random.normal(k7, (1, E), jnp.float32),
        })
    return params


def prepare_stacked_params(params, num_heads):
    """Lane-dense fused-kernel layout:
       attention weights (4, E, E) bf16 with 1/sqrt(Dh) folded into Wq,
       biases (4, 1, E) f32 (scale folded into bq), leading layer axis."""
    E = params[0]["sa_w"].shape[-1]
    Dh = E // num_heads
    scale = 1.0 / math.sqrt(Dh)

    def attn(pfx, p):
        w, b = p[pfx + "_w"], p[pfx + "_b"]
        w = jnp.concatenate([w[0:1] * scale, w[1:]], axis=0)        # fold scale into Wq
        b = jnp.concatenate([b[0:1] * scale, b[1:]], axis=0)        # ... and into bq
        return {pfx + "_w": w.astype(jnp.bfloat16), pfx + "_b": b[:, None, :]}

    per_layer = []
    for p in params:
        d = {}
        d.update(attn("sa", p))
        d.update(attn("ca", p))
        d.update({
            "ln1": p["ln1"], "ln2": p["ln2"],
            "ff_w1": p["ff_w1"].astype(jnp.bfloat16), "ff_b1": p["ff_b1"],
            "ff_w2": p["ff_w2"].astype(jnp.bfloat16), "ff_b2": p["ff_b2"],
        })
        per_layer.append(d)
    return {k: jnp.stack([d[k] for d in per_layer]) for k in per_layer[0]}


def decoder_reference(x, enc, stacked, num_heads):
    """Pure-JAX (XLA) reference using identical math (exact reciprocal)."""
    B, S, E = x.shape
    Se = enc.shape[1]
    Dh = E // num_heads
    L = stacked["ln1"].shape[0]
    x2 = x.reshape(B * S, E)
    enc2 = enc.astype(jnp.bfloat16).reshape(B * Se, E)
    for l in range(L):
        lp = {k: v[l] for k, v in stacked.items()}
        x2 = _decoder_layer(x2, enc2, lp, B, S, Se, num_heads, Dh, lambda d: 1.0 / d)
    return x2.reshape(B, S, E)


if __name__ == "__main__":
    B, S, Se, E, H, F, L = 2, 8, 8, 32, 4, 64, 2
    key = jax.random.PRNGKey(0)
    kx, ke, kp = jax.random.split(key, 3)
    x = jax.random.normal(kx, (B, S, E), jnp.float32)
    enc = jax.random.normal(ke, (B, Se, E), jnp.float32)
    params = init_decoder_params(kp, L, E, H, F)
    stacked = prepare_stacked_params(params, H)

    out = decoder_forward(x, None, enc, None, stacked, H)
    out = jax.block_until_ready(out)

    ref = decoder_reference(x, enc, stacked, H)
    ref = jax.block_until_ready(ref)

    assert out.shape == (B, S, E)
    assert jnp.allclose(out, ref, atol=2e-3, rtol=2e-3), "Pallas output mismatch vs reference"

    print("KERNEL_OK")
</pallas_src>

<mosaic_0001>
module attributes {stable_mosaic.version = 11 : i64} {
  func.func @_decoder_stack_kernel(%arg0: i32, %arg1: i32, %arg2: memref<16x32xf32, #tpu.memory_space<vmem>>, %arg3: memref<16x32xbf16, #tpu.memory_space<vmem>>, %arg4: memref<1x4x32x32xbf16, #tpu.memory_space<vmem>>, %arg5: memref<1x4x1x32xf32, #tpu.memory_space<vmem>>, %arg6: memref<1x2x32xf32, #tpu.memory_space<vmem>>, %arg7: memref<1x4x32x32xbf16, #tpu.memory_space<vmem>>, %arg8: memref<1x4x1x32xf32, #tpu.memory_space<vmem>>, %arg9: memref<1x2x32xf32, #tpu.memory_space<vmem>>, %arg10: memref<1x32x64xbf16, #tpu.memory_space<vmem>>, %arg11: memref<1x1x64xf32, #tpu.memory_space<vmem>>, %arg12: memref<1x64x32xbf16, #tpu.memory_space<vmem>>, %arg13: memref<1x1x32xf32, #tpu.memory_space<vmem>>, %arg14: memref<16x32xf32, #tpu.memory_space<vmem>>, %arg15: memref<16x32xf32, #tpu.memory_space<vmem>>) attributes {dimension_semantics = [#tpu.dimension_semantics<parallel>, #tpu.dimension_semantics<arbitrary>], iteration_bounds = array<i64: 1, 2>, scalar_prefetch = 0 : i64, scratch_operands = 1 : i64, tpu.core_type = #tpu.core_type<tc>, window_params = [{transform_indices = @transform_0, window_bounds = array<i64: 16, 32>}, {transform_indices = @transform_1, window_bounds = array<i64: 16, 32>}, {transform_indices = @transform_2, window_bounds = array<i64: 1, 4, 32, 32>}, {transform_indices = @transform_3, window_bounds = array<i64: 1, 4, 1, 32>}, {transform_indices = @transform_4, window_bounds = array<i64: 1, 2, 32>}, {transform_indices = @transform_5, window_bounds = array<i64: 1, 4, 32, 32>}, {transform_indices = @transform_6, window_bounds = array<i64: 1, 4, 1, 32>}, {transform_indices = @transform_7, window_bounds = array<i64: 1, 2, 32>}, {transform_indices = @transform_8, window_bounds = array<i64: 1, 32, 64>}, {transform_indices = @transform_9, window_bounds = array<i64: 1, 1, 64>}, {transform_indices = @transform_10, window_bounds = array<i64: 1, 64, 32>}, {transform_indices = @transform_11, window_bounds = array<i64: 1, 1, 32>}, {transform_indices = @transform_12, window_bounds = array<i64: 16, 32>}]} {
    %c0_i32 = arith.constant 0 : i32
    %0 = arith.cmpi eq, %arg1, %c0_i32 : i32
    %1 = arith.extui %0 : i1 to i32
    %c0_i32_0 = arith.constant 0 : i32
    %2 = arith.cmpi ne, %1, %c0_i32_0 : i32
    scf.if %2 {
      %c0_76 = arith.constant 0 : index
      %c0_77 = arith.constant 0 : index
      %369 = vector.load %arg2[%c0_76, %c0_77] : memref<16x32xf32, #tpu.memory_space<vmem>>, vector<16x32xf32>
      %c0_78 = arith.constant 0 : index
      %c0_79 = arith.constant 0 : index
      %370 = vector.load %arg15[%c0_78, %c0_79] : memref<16x32xf32, #tpu.memory_space<vmem>>, vector<16x32xf32>
      tpu.vector_store %arg15[%c0_78, %c0_79], %369 {strides = array<i32>} : memref<16x32xf32, #tpu.memory_space<vmem>>, vector<16x32xf32>,
    } else {
    }
    %c0 = arith.constant 0 : index
    %c0_1 = arith.constant 0 : index
    %c0_2 = arith.constant 0 : index
    %c0_3 = arith.constant 0 : index
    %3 = vector.load %arg4[%c0, %c0_1, %c0_2, %c0_3] : memref<1x4x32x32xbf16, #tpu.memory_space<vmem>>, vector<1x4x32x32xbf16>
    %4 = vector.shape_cast %3 : vector<1x4x32x32xbf16> to vector<4x32x32xbf16>
    %c0_4 = arith.constant 0 : index
    %c0_5 = arith.constant 0 : index
    %c0_6 = arith.constant 0 : index
    %c0_7 = arith.constant 0 : index
    %5 = vector.load %arg5[%c0_4, %c0_5, %c0_6, %c0_7] : memref<1x4x1x32xf32, #tpu.memory_space<vmem>>, vector<1x4x1x32xf32>
    %6 = vector.shape_cast %5 : vector<1x4x1x32xf32> to vector<4x1x32xf32>
    %c0_8 = arith.constant 0 : index
    %c0_9 = arith.constant 0 : index
    %c0_10 = arith.constant 0 : index
    %7 = vector.load %arg6[%c0_8, %c0_9, %c0_10] : memref<1x2x32xf32, #tpu.memory_space<vmem>>, vector<1x2x32xf32>
    %8 = vector.shape_cast %7 : vector<1x2x32xf32> to vector<2x32xf32>
    %c0_11 = arith.constant 0 : index
    %c0_12 = arith.constant 0 : index
    %c0_13 = arith.constant 0 : index
    %c0_14 = arith.constant 0 : index
    %9 = vector.load %arg7[%c0_11, %c0_12, %c0_13, %c0_14] : memref<1x4x32x32xbf16, #tpu.memory_space<vmem>>, vector<1x4x32x32xbf16>
    %10 = vector.shape_cast %9 : vector<1x4x32x32xbf16> to vector<4x32x32xbf16>
    %c0_15 = arith.constant 0 : index
    %c0_16 = arith.constant 0 : index
    %c0_17 = arith.constant 0 : index
    %c0_18 = arith.constant 0 : index
    %11 = vector.load %arg8[%c0_15, %c0_16, %c0_17, %c0_18] : memref<1x4x1x32xf32, #tpu.memory_space<vmem>>, vector<1x4x1x32xf32>
    %12 = vector.shape_cast %11 : vector<1x4x1x32xf32> to vector<4x1x32xf32>
    %c0_19 = arith.constant 0 : index
    %c0_20 = arith.constant 0 : index
    %c0_21 = arith.constant 0 : index
    %13 = vector.load %arg9[%c0_19, %c0_20, %c0_21] : memref<1x2x32xf32, #tpu.memory_space<vmem>>, vector<1x2x32xf32>
    %14 = vector.shape_cast %13 : vector<1x2x32xf32> to vector<2x32xf32>
    %c0_22 = arith.constant 0 : index
    %c0_23 = arith.constant 0 : index
    %c0_24 = arith.constant 0 : index
    %15 = vector.load %arg10[%c0_22, %c0_23, %c0_24] : memref<1x32x64xbf16, #tpu.memory_space<vmem>>, vector<1x32x64xbf16>
    %16 = vector.shape_cast %15 : vector<1x32x64xbf16> to vector<32x64xbf16>
    %c0_25 = arith.constant 0 : index
    %c0_26 = arith.constant 0 : index
    %c0_27 = arith.constant 0 : index
    %17 = vector.load %arg11[%c0_25, %c0_26, %c0_27] : memref<1x1x64xf32, #tpu.memory_space<vmem>>, vector<1x1x64xf32>
    %18 = vector.shape_cast %17 : vector<1x1x64xf32> to vector<1x64xf32>
    %c0_28 = arith.constant 0 : index
    %c0_29 = arith.constant 0 : index
    %c0_30 = arith.constant 0 : index
    %19 = vector.load %arg12[%c0_28, %c0_29, %c0_30] : memref<1x64x32xbf16, #tpu.memory_space<vmem>>, vector<1x64x32xbf16>
    %20 = vector.shape_cast %19 : vector<1x64x32xbf16> to vector<64x32xbf16>
    %c0_31 = arith.constant 0 : index
    %c0_32 = arith.constant 0 : index
    %c0_33 = arith.constant 0 : index
    %21 = vector.load %arg13[%c0_31, %c0_32, %c0_33] : memref<1x1x32xf32, #tpu.memory_space<vmem>>, vector<1x1x32xf32>
    %22 = vector.shape_cast %21 : vector<1x1x32xf32> to vector<1x32xf32>
    %c0_34 = arith.constant 0 : index
    %c0_35 = arith.constant 0 : index
    %23 = vector.load %arg15[%c0_34, %c0_35] : memref<16x32xf32, #tpu.memory_space<vmem>>, vector<16x32xf32>
    %c0_36 = arith.constant 0 : index
    %c0_37 = arith.constant 0 : index
    %24 = vector.load %arg3[%c0_36, %c0_37] : memref<16x32xbf16, #tpu.memory_space<vmem>>, vector<16x32xbf16>
    %25 = arith.truncf %23 : vector<16x32xf32> to vector<16x32xbf16>
    %26 = vector.extract_strided_slice %4 {offsets = [0, 0, 0], sizes = [1, 32, 32], strides = [1, 1, 1]} : vector<4x32x32xbf16> to vector<1x32x32xbf16>
    %27 = vector.shape_cast %26 : vector<1x32x32xbf16> to vector<32x32xbf16>
    %cst = arith.constant dense<0.000000e+00> : vector<16x32xf32>
    %28 = tpu.matmul %25, %27, %cst {dimension_numbers = #tpu.dot_dimension_numbers<[1], [0], [0], [1], [0, 0, 1, 1], [], []>} : vector<16x32xbf16>, vector<32x32xbf16>, vector<16x32xf32> -> vector<16x32xf32>
    %29 = vector.extract_strided_slice %6 {offsets = [0, 0, 0], sizes = [1, 1, 32], strides = [1, 1, 1]} : vector<4x1x32xf32> to vector<1x1x32xf32>
    %30 = vector.shape_cast %29 : vector<1x1x32xf32> to vector<1x32xf32>
    %31 = vector.broadcast %30 : vector<1x32xf32> to vector<16x32xf32>
    %32 = arith.addf %28, %31 : vector<16x32xf32>
    %33 = arith.truncf %23 : vector<16x32xf32> to vector<16x32xbf16>
    %34 = vector.extract_strided_slice %4 {offsets = [1, 0, 0], sizes = [1, 32, 32], strides = [1, 1, 1]} : vector<4x32x32xbf16> to vector<1x32x32xbf16>
    %35 = vector.shape_cast %34 : vector<1x32x32xbf16> to vector<32x32xbf16>
    %cst_38 = arith.constant dense<0.000000e+00> : vector<16x32xf32>
    %36 = tpu.matmul %33, %35, %cst_38 {dimension_numbers = #tpu.dot_dimension_numbers<[1], [0], [0], [1], [0, 0, 1, 1], [], []>} : vector<16x32xbf16>, vector<32x32xbf16>, vector<16x32xf32> -> vector<16x32xf32>
    %37 = vector.extract_strided_slice %6 {offsets = [1, 0, 0], sizes = [1, 1, 32], strides = [1, 1, 1]} : vector<4x1x32xf32> to vector<1x1x32xf32>
    %38 = vector.shape_cast %37 : vector<1x1x32xf32> to vector<1x32xf32>
    %39 = vector.broadcast %38 : vector<1x32xf32> to vector<16x32xf32>
    %40 = arith.addf %36, %39 : vector<16x32xf32>
    %41 = arith.truncf %23 : vector<16x32xf32> to vector<16x32xbf16>
    %42 = vector.extract_strided_slice %4 {offsets = [2, 0, 0], sizes = [1, 32, 32], strides = [1, 1, 1]} : vector<4x32x32xbf16> to vector<1x32x32xbf16>
    %43 = vector.shape_cast %42 : vector<1x32x32xbf16> to vector<32x32xbf16>
    %cst_39 = arith.constant dense<0.000000e+00> : vector<16x32xf32>
    %44 = tpu.matmul %41, %43, %cst_39 {dimension_numbers = #tpu.dot_dimension_numbers<[1], [0], [0], [1], [0, 0, 1, 1], [], []>} : vector<16x32xbf16>, vector<32x32xbf16>, vector<16x32xf32> -> vector<16x32xf32>
    %45 = vector.extract_strided_slice %6 {offsets = [2, 0, 0], sizes = [1, 1, 32], strides = [1, 1, 1]} : vector<4x1x32xf32> to vector<1x1x32xf32>
    %46 = vector.shape_cast %45 : vector<1x1x32xf32> to vector<1x32xf32>
    %47 = vector.broadcast %46 : vector<1x32xf32> to vector<16x32xf32>
    %48 = arith.addf %44, %47 : vector<16x32xf32>
    %49 = vector.extract_strided_slice %32 {offsets = [0, 0], sizes = [8, 32], strides = [1, 1]} : vector<16x32xf32> to vector<8x32xf32>
    %50 = vector.extract_strided_slice %49 {offsets = [0, 0], sizes = [8, 8], strides = [1, 1]} : vector<8x32xf32> to vector<8x8xf32>
    %51 = vector.shape_cast %50 : vector<8x8xf32> to vector<1x8x8xf32>
    %52 = vector.extract_strided_slice %49 {offsets = [0, 8], sizes = [8, 8], strides = [1, 1]} : vector<8x32xf32> to vector<8x8xf32>
    %53 = vector.shape_cast %52 : vector<8x8xf32> to vector<1x8x8xf32>
    %54 = vector.extract_strided_slice %49 {offsets = [0, 16], sizes = [8, 8], strides = [1, 1]} : vector<8x32xf32> to vector<8x8xf32>
    %55 = vector.shape_cast %54 : vector<8x8xf32> to vector<1x8x8xf32>
    %56 = vector.extract_strided_slice %49 {offsets = [0, 24], sizes = [8, 8], strides = [1, 1]} : vector<8x32xf32> to vector<8x8xf32>
    %57 = vector.shape_cast %56 : vector<8x8xf32> to vector<1x8x8xf32>
    %58 = vector.extract_strided_slice %32 {offsets = [8, 0], sizes = [8, 32], strides = [1, 1]} : vector<16x32xf32> to vector<8x32xf32>
    %59 = vector.extract_strided_slice %58 {offsets = [0, 0], sizes = [8, 8], strides = [1, 1]} : vector<8x32xf32> to vector<8x8xf32>
    %60 = vector.shape_cast %59 : vector<8x8xf32> to vector<1x8x8xf32>
    %61 = vector.extract_strided_slice %58 {offsets = [0, 8], sizes = [8, 8], strides = [1, 1]} : vector<8x32xf32> to vector<8x8xf32>
    %62 = vector.shape_cast %61 : vector<8x8xf32> to vector<1x8x8xf32>
    %63 = vector.extract_strided_slice %58 {offsets = [0, 16], sizes = [8, 8], strides = [1, 1]} : vector<8x32xf32> to vector<8x8xf32>
    %64 = vector.shape_cast %63 : vector<8x8xf32> to vector<1x8x8xf32>
    %65 = vector.extract_strided_slice %58 {offsets = [0, 24], sizes = [8, 8], strides = [1, 1]} : vector<8x32xf32> to vector<8x8xf32>
    %66 = vector.shape_cast %65 : vector<8x8xf32> to vector<1x8x8xf32>
    %67 = tpu.concatenate %51, %53, %55, %57, %60, %62, %64, %66 in 0 : vector<1x8x8xf32>, vector<1x8x8xf32>, vector<1x8x8xf32>, vector<1x8x8xf32>, vector<1x8x8xf32>, vector<1x8x8xf32>, vector<1x8x8xf32>, vector<1x8x8xf32> -> vector<8x8x8xf32>
    %68 = arith.truncf %67 : vector<8x8x8xf32> to vector<8x8x8xbf16>
    %69 = vector.extract_strided_slice %40 {offsets = [0, 0], sizes = [8, 32], strides = [1, 1]} : vector<16x32xf32> to vector<8x32xf32>
    %70 = vector.extract_strided_slice %69 {offsets = [0, 0], sizes = [8, 8], strides = [1, 1]} : vector<8x32xf32> to vector<8x8xf32>
    %71 = vector.shape_cast %70 : vector<8x8xf32> to vector<1x8x8xf32>
    %72 = vector.extract_strided_slice %69 {offsets = [0, 8], sizes = [8, 8], strides = [1, 1]} : vector<8x32xf32> to vector<8x8xf32>
    %73 = vector.shape_cast %72 : vector<8x8xf32> to vector<1x8x8xf32>
    %74 = vector.extract_strided_slice %69 {offsets = [0, 16], sizes = [8, 8], strides = [1, 1]} : vector<8x32xf32> to vector<8x8xf32>
    %75 = vector.shape_cast %74 : vector<8x8xf32> to vector<1x8x8xf32>
    %76 = vector.extract_strided_slice %69 {offsets = [0, 24], sizes = [8, 8], strides = [1, 1]} : vector<8x32xf32> to vector<8x8xf32>
    %77 = vector.shape_cast %76 : vector<8x8xf32> to vector<1x8x8xf32>
    %78 = vector.extract_strided_slice %40 {offsets = [8, 0], sizes = [8, 32], strides = [1, 1]} : vector<16x32xf32> to vector<8x32xf32>
    %79 = vector.extract_strided_slice %78 {offsets = [0, 0], sizes = [8, 8], strides = [1, 1]} : vector<8x32xf32> to vector<8x8xf32>
    %80 = vector.shape_cast %79 : vector<8x8xf32> to vector<1x8x8xf32>
    %81 = vector.extract_strided_slice %78 {offsets = [0, 8], sizes = [8, 8], strides = [1, 1]} : vector<8x32xf32> to vector<8x8xf32>
    %82 = vector.shape_cast %81 : vector<8x8xf32> to vector<1x8x8xf32>
    %83 = vector.extract_strided_slice %78 {offsets = [0, 16], sizes = [8, 8], strides = [1, 1]} : vector<8x32xf32> to vector<8x8xf32>
    %84 = vector.shape_cast %83 : vector<8x8xf32> to vector<1x8x8xf32>
    %85 = vector.extract_strided_slice %78 {offsets = [0, 24], sizes = [8, 8], strides = [1, 1]} : vector<8x32xf32> to vector<8x8xf32>
    %86 = vector.shape_cast %85 : vector<8x8xf32> to vector<1x8x8xf32>
    %87 = tpu.concatenate %71, %73, %75, %77, %80, %82, %84, %86 in 0 : vector<1x8x8xf32>, vector<1x8x8xf32>, vector<1x8x8xf32>, vector<1x8x8xf32>, vector<1x8x8xf32>, vector<1x8x8xf32>, vector<1x8x8xf32>, vector<1x8x8xf32> -> vector<8x8x8xf32>
    %88 = arith.truncf %87 : vector<8x8x8xf32> to vector<8x8x8xbf16>
    %89 = vector.extract_strided_slice %48 {offsets = [0, 0], sizes = [8, 32], strides = [1, 1]} : vector<16x32xf32> to vector<8x32xf32>
    %90 = vector.extract_strided_slice %89 {offsets = [0, 0], sizes = [8, 8], strides = [1, 1]} : vector<8x32xf32> to vector<8x8xf32>
    %91 = vector.shape_cast %90 : vector<8x8xf32> to vector<1x8x8xf32>
    %92 = vector.extract_strided_slice %89 {offsets = [0, 8], sizes = [8, 8], strides = [1, 1]} : vector<8x32xf32> to vector<8x8xf32>
    %93 = vector.shape_cast %92 : vector<8x8xf32> to vector<1x8x8xf32>
    %94 = vector.extract_strided_slice %89 {offsets = [0, 16], sizes = [8, 8], strides = [1, 1]} : vector<8x32xf32> to vector<8x8xf32>
    %95 = vector.shape_cast %94 : vector<8x8xf32> to vector<1x8x8xf32>
    %96 = vector.extract_strided_slice %89 {offsets = [0, 24], sizes = [8, 8], strides = [1, 1]} : vector<8x32xf32> to vector<8x8xf32>
    %97 = vector.shape_cast %96 : vector<8x8xf32> to vector<1x8x8xf32>
    %98 = vector.extract_strided_slice %48 {offsets = [8, 0], sizes = [8, 32], strides = [1, 1]} : vector<16x32xf32> to vector<8x32xf32>
    %99 = vector.extract_strided_slice %98 {offsets = [0, 0], sizes = [8, 8], strides = [1, 1]} : vector<8x32xf32> to vector<8x8xf32>
    %100 = vector.shape_cast %99 : vector<8x8xf32> to vector<1x8x8xf32>
    %101 = vector.extract_strided_slice %98 {offsets = [0, 8], sizes = [8, 8], strides = [1, 1]} : vector<8x32xf32> to vector<8x8xf32>
    %102 = vector.shape_cast %101 : vector<8x8xf32> to vector<1x8x8xf32>
    %103 = vector.extract_strided_slice %98 {offsets = [0, 16], sizes = [8, 8], strides = [1, 1]} : vector<8x32xf32> to vector<8x8xf32>
    %104 = vector.shape_cast %103 : vector<8x8xf32> to vector<1x8x8xf32>
    %105 = vector.extract_strided_slice %98 {offsets = [0, 24], sizes = [8, 8], strides = [1, 1]} : vector<8x32xf32> to vector<8x8xf32>
    %106 = vector.shape_cast %105 : vector<8x8xf32> to vector<1x8x8xf32>
    %107 = tpu.concatenate %91, %93, %95, %97, %100, %102, %104, %106 in 0 : vector<1x8x8xf32>, vector<1x8x8xf32>, vector<1x8x8xf32>, vector<1x8x8xf32>, vector<1x8x8xf32>, vector<1x8x8xf32>, vector<1x8x8xf32>, vector<1x8x8xf32> -> vector<8x8x8xf32>
    %108 = arith.truncf %107 : vector<8x8x8xf32> to vector<8x8x8xbf16>
    "tpu.trace_start"() <{level = 10 : i32, message = "bqd,bkd->bqk"}> : () -> ()
    %cst_40 = arith.constant dense<0.000000e+00> : vector<8x8x8xf32>
    %109 = tpu.matmul %68, %88, %cst_40 {dimension_numbers = #tpu.dot_dimension_numbers<[2], [2], [1], [1], [0, 0, 0, 1, 1, 1], [0], [0]>} : vector<8x8x8xbf16>, vector<8x8x8xbf16>, vector<8x8x8xf32> -> vector<8x8x8xf32>
    "tpu.trace_stop"() : () -> ()
    %110 = tpu.iota {dimensions = array<i32: 0>} : vector<8x8xi32>
    %111 = tpu.iota {dimensions = array<i32: 1>} : vector<8x8xi32>
    %112 = arith.cmpi sge, %110, %111 : vector<8x8xi32>
    %cst_41 = arith.constant 0.000000e+00 : f32
    %cst_42 = arith.constant -1.000000e+30 : f32
    %113 = vector.broadcast %cst_41 : f32 to vector<8x8xf32>
    %114 = vector.broadcast %cst_42 : f32 to vector<8x8xf32>
    %115 = arith.select %112, %113, %114 : vector<8x8xi1>, vector<8x8xf32>
    %116 = vector.shape_cast %115 : vector<8x8xf32> to vector<1x8x8xf32>
    %117 = vector.broadcast %116 : vector<1x8x8xf32> to vector<8x8x8xf32>
    %118 = arith.addf %109, %117 : vector<8x8x8xf32>
    %cst_43 = arith.constant dense<0xFF800000> : vector<8x8xf32>
    %119 = vector.multi_reduction <maximumf>, %118, %cst_43 [2] : vector<8x8x8xf32> to vector<8x8xf32>
    %120 = vector.shape_cast %119 : vector<8x8xf32> to vector<8x8x1xf32>
    %121 = vector.broadcast %120 : vector<8x8x1xf32> to vector<8x8x8xf32>
    %122 = arith.subf %118, %121 : vector<8x8x8xf32>
    %123 = math.exp %122 : vector<8x8x8xf32>
    %cst_44 = arith.constant dense<0.000000e+00> : vector<8x8xf32>
    %124 = vector.multi_reduction <add>, %123, %cst_44 [2] : vector<8x8x8xf32> to vector<8x8xf32>
    %125 = vector.shape_cast %124 : vector<8x8xf32> to vector<8x8x1xf32>
    %126 = tpu.reciprocal %125 {approx = true} : vector<8x8x1xf32> -> vector<8x8x1xf32>
    %127 = vector.broadcast %126 : vector<8x8x1xf32> to vector<8x8x8xf32>
    %128 = arith.mulf %123, %127 : vector<8x8x8xf32>
    %129 = arith.truncf %128 : vector<8x8x8xf32> to vector<8x8x8xbf16>
    "tpu.trace_start"() <{level = 10 : i32, message = "bqk,bkd->bqd"}> : () -> ()
    %cst_45 = arith.constant dense<0.000000e+00> : vector<8x8x8xf32>
    %130 = tpu.matmul %129, %108, %cst_45 {dimension_numbers = #tpu.dot_dimension_numbers<[2], [1], [1], [2], [0, 0, 0, 1, 1, 2], [0], [0]>} : vector<8x8x8xbf16>, vector<8x8x8xbf16>, vector<8x8x8xf32> -> vector<8x8x8xf32>
    "tpu.trace_stop"() : () -> ()
    %131 = vector.extract_strided_slice %130 {offsets = [0, 0, 0], sizes = [1, 8, 8], strides = [1, 1, 1]} : vector<8x8x8xf32> to vector<1x8x8xf32>
    %132 = vector.shape_cast %131 : vector<1x8x8xf32> to vector<8x8xf32>
    %133 = vector.extract_strided_slice %130 {offsets = [1, 0, 0], sizes = [1, 8, 8], strides = [1, 1, 1]} : vector<8x8x8xf32> to vector<1x8x8xf32>
    %134 = vector.shape_cast %133 : vector<1x8x8xf32> to vector<8x8xf32>
    %135 = vector.extract_strided_slice %130 {offsets = [2, 0, 0], sizes = [1, 8, 8], strides = [1, 1, 1]} : vector<8x8x8xf32> to vector<1x8x8xf32>
    %136 = vector.shape_cast %135 : vector<1x8x8xf32> to vector<8x8xf32>
    %137 = vector.extract_strided_slice %130 {offsets = [3, 0, 0], sizes = [1, 8, 8], strides = [1, 1, 1]} : vector<8x8x8xf32> to vector<1x8x8xf32>
    %138 = vector.shape_cast %137 : vector<1x8x8xf32> to vector<8x8xf32>
    %139 = tpu.concatenate %132, %134, %136, %138 in 1 : vector<8x8xf32>, vector<8x8xf32>, vector<8x8xf32>, vector<8x8xf32> -> vector<8x32xf32>
    %140 = vector.extract_strided_slice %130 {offsets = [4, 0, 0], sizes = [1, 8, 8], strides = [1, 1, 1]} : vector<8x8x8xf32> to vector<1x8x8xf32>
    %141 = vector.shape_cast %140 : vector<1x8x8xf32> to vector<8x8xf32>
    %142 = vector.extract_strided_slice %130 {offsets = [5, 0, 0], sizes = [1, 8, 8], strides = [1, 1, 1]} : vector<8x8x8xf32> to vector<1x8x8xf32>
    %143 = vector.shape_cast %142 : vector<1x8x8xf32> to vector<8x8xf32>
    %144 = vector.extract_strided_slice %130 {offsets = [6, 0, 0], sizes = [1, 8, 8], strides = [1, 1, 1]} : vector<8x8x8xf32> to vector<1x8x8xf32>
    %145 = vector.shape_cast %144 : vector<1x8x8xf32> to vector<8x8xf32>
    %146 = vector.extract_strided_slice %130 {offsets = [7, 0, 0], sizes = [1, 8, 8], strides = [1, 1, 1]} : vector<8x8x8xf32> to vector<1x8x8xf32>
    %147 = vector.shape_cast %146 : vector<1x8x8xf32> to vector<8x8xf32>
    %148 = tpu.concatenate %141, %143, %145, %147 in 1 : vector<8x8xf32>, vector<8x8xf32>, vector<8x8xf32>, vector<8x8xf32> -> vector<8x32xf32>
    %149 = tpu.concatenate %139, %148 in 0 : vector<8x32xf32>, vector<8x32xf32> -> vector<16x32xf32>
    %150 = arith.truncf %149 : vector<16x32xf32> to vector<16x32xbf16>
    %151 = vector.extract_strided_slice %4 {offsets = [3, 0, 0], sizes = [1, 32, 32], strides = [1, 1, 1]} : vector<4x32x32xbf16> to vector<1x32x32xbf16>
    %152 = vector.shape_cast %151 : vector<1x32x32xbf16> to vector<32x32xbf16>
    %cst_46 = arith.constant dense<0.000000e+00> : vector<16x32xf32>
    %153 = tpu.matmul %150, %152, %cst_46 {dimension_numbers = #tpu.dot_dimension_numbers<[1], [0], [0], [1], [0, 0, 1, 1], [], []>} : vector<16x32xbf16>, vector<32x32xbf16>, vector<16x32xf32> -> vector<16x32xf32>
    %154 = vector.extract_strided_slice %6 {offsets = [3, 0, 0], sizes = [1, 1, 32], strides = [1, 1, 1]} : vector<4x1x32xf32> to vector<1x1x32xf32>
    %155 = vector.shape_cast %154 : vector<1x1x32xf32> to vector<1x32xf32>
    %156 = vector.broadcast %155 : vector<1x32xf32> to vector<16x32xf32>
    %157 = arith.addf %153, %156 : vector<16x32xf32>
    %158 = arith.addf %157, %23 : vector<16x32xf32>
    %159 = vector.extract_strided_slice %8 {offsets = [0, 0], sizes = [1, 32], strides = [1, 1]} : vector<2x32xf32> to vector<1x32xf32>
    %160 = vector.extract_strided_slice %8 {offsets = [1, 0], sizes = [1, 32], strides = [1, 1]} : vector<2x32xf32> to vector<1x32xf32>
    %cst_47 = arith.constant dense<0.000000e+00> : vector<16xf32>
    %161 = vector.multi_reduction <add>, %158, %cst_47 [1] : vector<16x32xf32> to vector<16xf32>
    %162 = vector.shape_cast %161 : vector<16xf32> to vector<16x1xf32>
    %cst_48 = arith.constant 3.200000e+01 : f32
    %163 = vector.broadcast %cst_48 : f32 to vector<16x1xf32>
    %164 = arith.divf %162, %163 : vector<16x1xf32>
    %165 = vector.broadcast %164 : vector<16x1xf32> to vector<16x32xf32>
    %166 = arith.subf %158, %165 : vector<16x32xf32>
    %167 = arith.mulf %166, %166 : vector<16x32xf32>
    %cst_49 = arith.constant dense<0.000000e+00> : vector<16xf32>
    %168 = vector.multi_reduction <add>, %167, %cst_49 [1] : vector<16x32xf32> to vector<16xf32>
    %169 = vector.shape_cast %168 : vector<16xf32> to vector<16x1xf32>
    %cst_50 = arith.constant 3.200000e+01 : f32
    %170 = vector.broadcast %cst_50 : f32 to vector<16x1xf32>
    %171 = arith.divf %169, %170 : vector<16x1xf32>
    %172 = vector.broadcast %164 : vector<16x1xf32> to vector<16x32xf32>
    %173 = arith.subf %158, %172 : vector<16x32xf32>
    %cst_51 = arith.constant 9.99999974E-6 : f32
    %174 = vector.broadcast %cst_51 : f32 to vector<16x1xf32>
    %175 = arith.addf %171, %174 : vector<16x1xf32>
    %176 = math.rsqrt %175 : vector<16x1xf32>
    %177 = vector.broadcast %176 : vector<16x1xf32> to vector<16x32xf32>
    %178 = arith.mulf %173, %177 : vector<16x32xf32>
    %179 = vector.broadcast %159 : vector<1x32xf32> to vector<16x32xf32>
    %180 = arith.mulf %178, %179 : vector<16x32xf32>
    %181 = vector.broadcast %160 : vector<1x32xf32> to vector<16x32xf32>
    %182 = arith.addf %180, %181 : vector<16x32xf32>
    %183 = arith.truncf %182 : vector<16x32xf32> to vector<16x32xbf16>
    %184 = vector.extract_strided_slice %10 {offsets = [0, 0, 0], sizes = [1, 32, 32], strides = [1, 1, 1]} : vector<4x32x32xbf16> to vector<1x32x32xbf16>
    %185 = vector.shape_cast %184 : vector<1x32x32xbf16> to vector<32x32xbf16>
    %cst_52 = arith.constant dense<0.000000e+00> : vector<16x32xf32>
    %186 = tpu.matmul %183, %185, %cst_52 {dimension_numbers = #tpu.dot_dimension_numbers<[1], [0], [0], [1], [0, 0, 1, 1], [], []>} : vector<16x32xbf16>, vector<32x32xbf16>, vector<16x32xf32> -> vector<16x32xf32>
    %187 = vector.extract_strided_slice %12 {offsets = [0, 0, 0], sizes = [1, 1, 32], strides = [1, 1, 1]} : vector<4x1x32xf32> to vector<1x1x32xf32>
    %188 = vector.shape_cast %187 : vector<1x1x32xf32> to vector<1x32xf32>
    %189 = vector.broadcast %188 : vector<1x32xf32> to vector<16x32xf32>
    %190 = arith.addf %186, %189 : vector<16x32xf32>
    %191 = vector.extract_strided_slice %10 {offsets = [1, 0, 0], sizes = [1, 32, 32], strides = [1, 1, 1]} : vector<4x32x32xbf16> to vector<1x32x32xbf16>
    %192 = vector.shape_cast %191 : vector<1x32x32xbf16> to vector<32x32xbf16>
    %cst_53 = arith.constant dense<0.000000e+00> : vector<16x32xf32>
    %193 = tpu.matmul %24, %192, %cst_53 {dimension_numbers = #tpu.dot_dimension_numbers<[1], [0], [0], [1], [0, 0, 1, 1], [], []>} : vector<16x32xbf16>, vector<32x32xbf16>, vector<16x32xf32> -> vector<16x32xf32>
    %194 = vector.extract_strided_slice %12 {offsets = [1, 0, 0], sizes = [1, 1, 32], strides = [1, 1, 1]} : vector<4x1x32xf32> to vector<1x1x32xf32>
    %195 = vector.shape_cast %194 : vector<1x1x32xf32> to vector<1x32xf32>
    %196 = vector.broadcast %195 : vector<1x32xf32> to vector<16x32xf32>
    %197 = arith.addf %193, %196 : vector<16x32xf32>
    %198 = vector.extract_strided_slice %10 {offsets = [2, 0, 0], sizes = [1, 32, 32], strides = [1, 1, 1]} : vector<4x32x32xbf16> to vector<1x32x32xbf16>
    %199 = vector.shape_cast %198 : vector<1x32x32xbf16> to vector<32x32xbf16>
    %cst_54 = arith.constant dense<0.000000e+00> : vector<16x32xf32>
    %200 = tpu.matmul %24, %199, %cst_54 {dimension_numbers = #tpu.dot_dimension_numbers<[1], [0], [0], [1], [0, 0, 1, 1], [], []>} : vector<16x32xbf16>, vector<32x32xbf16>, vector<16x32xf32> -> vector<16x32xf32>
    %201 = vector.extract_strided_slice %12 {offsets = [2, 0, 0], sizes = [1, 1, 32], strides = [1, 1, 1]} : vector<4x1x32xf32> to vector<1x1x32xf32>
    %202 = vector.shape_cast %201 : vector<1x1x32xf32> to vector<1x32xf32>
    %203 = vector.broadcast %202 : vector<1x32xf32> to vector<16x32xf32>
    %204 = arith.addf %200, %203 : vector<16x32xf32>
    %205 = vector.extract_strided_slice %190 {offsets = [0, 0], sizes = [8, 32], strides = [1, 1]} : vector<16x32xf32> to vector<8x32xf32>
    %206 = vector.extract_strided_slice %205 {offsets = [0, 0], sizes = [8, 8], strides = [1, 1]} : vector<8x32xf32> to vector<8x8xf32>
    %207 = vector.shape_cast %206 : vector<8x8xf32> to vector<1x8x8xf32>
    %208 = vector.extract_strided_slice %205 {offsets = [0, 8], sizes = [8, 8], strides = [1, 1]} : vector<8x32xf32> to vector<8x8xf32>
    %209 = vector.shape_cast %208 : vector<8x8xf32> to vector<1x8x8xf32>
    %210 = vector.extract_strided_slice %205 {offsets = [0, 16], sizes = [8, 8], strides = [1, 1]} : vector<8x32xf32> to vector<8x8xf32>
    %211 = vector.shape_cast %210 : vector<8x8xf32> to vector<1x8x8xf32>
    %212 = vector.extract_strided_slice %205 {offsets = [0, 24], sizes = [8, 8], strides = [1, 1]} : vector<8x32xf32> to vector<8x8xf32>
    %213 = vector.shape_cast %212 : vector<8x8xf32> to vector<1x8x8xf32>
    %214 = vector.extract_strided_slice %190 {offsets = [8, 0], sizes = [8, 32], strides = [1, 1]} : vector<16x32xf32> to vector<8x32xf32>
    %215 = vector.extract_strided_slice %214 {offsets = [0, 0], sizes = [8, 8], strides = [1, 1]} : vector<8x32xf32> to vector<8x8xf32>
    %216 = vector.shape_cast %215 : vector<8x8xf32> to vector<1x8x8xf32>
    %217 = vector.extract_strided_slice %214 {offsets = [0, 8], sizes = [8, 8], strides = [1, 1]} : vector<8x32xf32> to vector<8x8xf32>
    %218 = vector.shape_cast %217 : vector<8x8xf32> to vector<1x8x8xf32>
    %219 = vector.extract_strided_slice %214 {offsets = [0, 16], sizes = [8, 8], strides = [1, 1]} : vector<8x32xf32> to vector<8x8xf32>
    %220 = vector.shape_cast %219 : vector<8x8xf32> to vector<1x8x8xf32>
    %221 = vector.extract_strided_slice %214 {offsets = [0, 24], sizes = [8, 8], strides = [1, 1]} : vector<8x32xf32> to vector<8x8xf32>
    %222 = vector.shape_cast %221 : vector<8x8xf32> to vector<1x8x8xf32>
    %223 = tpu.concatenate %207, %209, %211, %213, %216, %218, %220, %222 in 0 : vector<1x8x8xf32>, vector<1x8x8xf32>, vector<1x8x8xf32>, vector<1x8x8xf32>, vector<1x8x8xf32>, vector<1x8x8xf32>, vector<1x8x8xf32>, vector<1x8x8xf32> -> vector<8x8x8xf32>
    %224 = arith.truncf %223 : vector<8x8x8xf32> to vector<8x8x8xbf16>
    %225 = vector.extract_strided_slice %197 {offsets = [0, 0], sizes = [8, 32], strides = [1, 1]} : vector<16x32xf32> to vector<8x32xf32>
    %226 = vector.extract_strided_slice %225 {offsets = [0, 0], sizes = [8, 8], strides = [1, 1]} : vector<8x32xf32> to vector<8x8xf32>
    %227 = vector.shape_cast %226 : vector<8x8xf32> to vector<1x8x8xf32>
    %228 = vector.extract_strided_slice %225 {offsets = [0, 8], sizes = [8, 8], strides = [1, 1]} : vector<8x32xf32> to vector<8x8xf32>
    %229 = vector.shape_cast %228 : vector<8x8xf32> to vector<1x8x8xf32>
    %230 = vector.extract_strided_slice %225 {offsets = [0, 16], sizes = [8, 8], strides = [1, 1]} : vector<8x32xf32> to vector<8x8xf32>
    %231 = vector.shape_cast %230 : vector<8x8xf32> to vector<1x8x8xf32>
    %232 = vector.extract_strided_slice %225 {offsets = [0, 24], sizes = [8, 8], strides = [1, 1]} : vector<8x32xf32> to vector<8x8xf32>
    %233 = vector.shape_cast %232 : vector<8x8xf32> to vector<1x8x8xf32>
    %234 = vector.extract_strided_slice %197 {offsets = [8, 0], sizes = [8, 32], strides = [1, 1]} : vector<16x32xf32> to vector<8x32xf32>
    %235 = vector.extract_strided_slice %234 {offsets = [0, 0], sizes = [8, 8], strides = [1, 1]} : vector<8x32xf32> to vector<8x8xf32>
    %236 = vector.shape_cast %235 : vector<8x8xf32> to vector<1x8x8xf32>
    %237 = vector.extract_strided_slice %234 {offsets = [0, 8], sizes = [8, 8], strides = [1, 1]} : vector<8x32xf32> to vector<8x8xf32>
    %238 = vector.shape_cast %237 : vector<8x8xf32> to vector<1x8x8xf32>
    %239 = vector.extract_strided_slice %234 {offsets = [0, 16], sizes = [8, 8], strides = [1, 1]} : vector<8x32xf32> to vector<8x8xf32>
    %240 = vector.shape_cast %239 : vector<8x8xf32> to vector<1x8x8xf32>
    %241 = vector.extract_strided_slice %234 {offsets = [0, 24], sizes = [8, 8], strides = [1, 1]} : vector<8x32xf32> to vector<8x8xf32>
    %242 = vector.shape_cast %241 : vector<8x8xf32> to vector<1x8x8xf32>
    %243 = tpu.concatenate %227, %229, %231, %233, %236, %238, %240, %242 in 0 : vector<1x8x8xf32>, vector<1x8x8xf32>, vector<1x8x8xf32>, vector<1x8x8xf32>, vector<1x8x8xf32>, vector<1x8x8xf32>, vector<1x8x8xf32>, vector<1x8x8xf32> -> vector<8x8x8xf32>
    %244 = arith.truncf %243 : vector<8x8x8xf32> to vector<8x8x8xbf16>
    %245 = vector.extract_strided_slice %204 {offsets = [0, 0], sizes = [8, 32], strides = [1, 1]} : vector<16x32xf32> to vector<8x32xf32>
    %246 = vector.extract_strided_slice %245 {offsets = [0, 0], sizes = [8, 8], strides = [1, 1]} : vector<8x32xf32> to vector<8x8xf32>
    %247 = vector.shape_cast %246 : vector<8x8xf32> to vector<1x8x8xf32>
    %248 = vector.extract_strided_slice %245 {offsets = [0, 8], sizes = [8, 8], strides = [1, 1]} : vector<8x32xf32> to vector<8x8xf32>
    %249 = vector.shape_cast %248 : vector<8x8xf32> to vector<1x8x8xf32>
    %250 = vector.extract_strided_slice %245 {offsets = [0, 16], sizes = [8, 8], strides = [1, 1]} : vector<8x32xf32> to vector<8x8xf32>
    %251 = vector.shape_cast %250 : vector<8x8xf32> to vector<1x8x8xf32>
    %252 = vector.extract_strided_slice %245 {offsets = [0, 24], sizes = [8, 8], strides = [1, 1]} : vector<8x32xf32> to vector<8x8xf32>
    %253 = vector.shape_cast %252 : vector<8x8xf32> to vector<1x8x8xf32>
    %254 = vector.extract_strided_slice %204 {offsets = [8, 0], sizes = [8, 32], strides = [1, 1]} : vector<16x32xf32> to vector<8x32xf32>
    %255 = vector.extract_strided_slice %254 {offsets = [0, 0], sizes = [8, 8], strides = [1, 1]} : vector<8x32xf32> to vector<8x8xf32>
    %256 = vector.shape_cast %255 : vector<8x8xf32> to vector<1x8x8xf32>
    %257 = vector.extract_strided_slice %254 {offsets = [0, 8], sizes = [8, 8], strides = [1, 1]} : vector<8x32xf32> to vector<8x8xf32>
    %258 = vector.shape_cast %257 : vector<8x8xf32> to vector<1x8x8xf32>
    %259 = vector.extract_strided_slice %254 {offsets = [0, 16], sizes = [8, 8], strides = [1, 1]} : vector<8x32xf32> to vector<8x8xf32>
    %260 = vector.shape_cast %259 : vector<8x8xf32> to vector<1x8x8xf32>
    %261 = vector.extract_strided_slice %254 {offsets = [0, 24], sizes = [8, 8], strides = [1, 1]} : vector<8x32xf32> to vector<8x8xf32>
    %262 = vector.shape_cast %261 : vector<8x8xf32> to vector<1x8x8xf32>
    %263 = tpu.concatenate %247, %249, %251, %253, %256, %258, %260, %262 in 0 : vector<1x8x8xf32>, vector<1x8x8xf32>, vector<1x8x8xf32>, vector<1x8x8xf32>, vector<1x8x8xf32>, vector<1x8x8xf32>, vector<1x8x8xf32>, vector<1x8x8xf32> -> vector<8x8x8xf32>
    %264 = arith.truncf %263 : vector<8x8x8xf32> to vector<8x8x8xbf16>
    "tpu.trace_start"() <{level = 10 : i32, message = "bqd,bkd->bqk"}> : () -> ()
    %cst_55 = arith.constant dense<0.000000e+00> : vector<8x8x8xf32>
    %265 = tpu.matmul %224, %244, %cst_55 {dimension_numbers = #tpu.dot_dimension_numbers<[2], [2], [1], [1], [0, 0, 0, 1, 1, 1], [0], [0]>} : vector<8x8x8xbf16>, vector<8x8x8xbf16>, vector<8x8x8xf32> -> vector<8x8x8xf32>
    "tpu.trace_stop"() : () -> ()
    %cst_56 = arith.constant dense<0xFF800000> : vector<8x8xf32>
    %266 = vector.multi_reduction <maximumf>, %265, %cst_56 [2] : vector<8x8x8xf32> to vector<8x8xf32>
    %267 = vector.shape_cast %266 : vector<8x8xf32> to vector<8x8x1xf32>
    %268 = vector.broadcast %267 : vector<8x8x1xf32> to vector<8x8x8xf32>
    %269 = arith.subf %265, %268 : vector<8x8x8xf32>
    %270 = math.exp %269 : vector<8x8x8xf32>
    %cst_57 = arith.constant dense<0.000000e+00> : vector<8x8xf32>
    %271 = vector.multi_reduction <add>, %270, %cst_57 [2] : vector<8x8x8xf32> to vector<8x8xf32>
    %272 = vector.shape_cast %271 : vector<8x8xf32> to vector<8x8x1xf32>
    %273 = tpu.reciprocal %272 {approx = true} : vector<8x8x1xf32> -> vector<8x8x1xf32>
    %274 = vector.broadcast %273 : vector<8x8x1xf32> to vector<8x8x8xf32>
    %275 = arith.mulf %270, %274 : vector<8x8x8xf32>
    %276 = arith.truncf %275 : vector<8x8x8xf32> to vector<8x8x8xbf16>
    "tpu.trace_start"() <{level = 10 : i32, message = "bqk,bkd->bqd"}> : () -> ()
    %cst_58 = arith.constant dense<0.000000e+00> : vector<8x8x8xf32>
    %277 = tpu.matmul %276, %264, %cst_58 {dimension_numbers = #tpu.dot_dimension_numbers<[2], [1], [1], [2], [0, 0, 0, 1, 1, 2], [0], [0]>} : vector<8x8x8xbf16>, vector<8x8x8xbf16>, vector<8x8x8xf32> -> vector<8x8x8xf32>
    "tpu.trace_stop"() : () -> ()
    %278 = vector.extract_strided_slice %277 {offsets = [0, 0, 0], sizes = [1, 8, 8], strides = [1, 1, 1]} : vector<8x8x8xf32> to vector<1x8x8xf32>
    %279 = vector.shape_cast %278 : vector<1x8x8xf32> to vector<8x8xf32>
    %280 = vector.extract_strided_slice %277 {offsets = [1, 0, 0], sizes = [1, 8, 8], strides = [1, 1, 1]} : vector<8x8x8xf32> to vector<1x8x8xf32>
    %281 = vector.shape_cast %280 : vector<1x8x8xf32> to vector<8x8xf32>
    %282 = vector.extract_strided_slice %277 {offsets = [2, 0, 0], sizes = [1, 8, 8], strides = [1, 1, 1]} : vector<8x8x8xf32> to vector<1x8x8xf32>
    %283 = vector.shape_cast %282 : vector<1x8x8xf32> to vector<8x8xf32>
    %284 = vector.extract_strided_slice %277 {offsets = [3, 0, 0], sizes = [1, 8, 8], strides = [1, 1, 1]} : vector<8x8x8xf32> to vector<1x8x8xf32>
    %285 = vector.shape_cast %284 : vector<1x8x8xf32> to vector<8x8xf32>
    %286 = tpu.concatenate %279, %281, %283, %285 in 1 : vector<8x8xf32>, vector<8x8xf32>, vector<8x8xf32>, vector<8x8xf32> -> vector<8x32xf32>
    %287 = vector.extract_strided_slice %277 {offsets = [4, 0, 0], sizes = [1, 8, 8], strides = [1, 1, 1]} : vector<8x8x8xf32> to vector<1x8x8xf32>
    %288 = vector.shape_cast %287 : vector<1x8x8xf32> to vector<8x8xf32>
    %289 = vector.extract_strided_slice %277 {offsets = [5, 0, 0], sizes = [1, 8, 8], strides = [1, 1, 1]} : vector<8x8x8xf32> to vector<1x8x8xf32>
    %290 = vector.shape_cast %289 : vector<1x8x8xf32> to vector<8x8xf32>
    %291 = vector.extract_strided_slice %277 {offsets = [6, 0, 0], sizes = [1, 8, 8], strides = [1, 1, 1]} : vector<8x8x8xf32> to vector<1x8x8xf32>
    %292 = vector.shape_cast %291 : vector<1x8x8xf32> to vector<8x8xf32>
    %293 = vector.extract_strided_slice %277 {offsets = [7, 0, 0], sizes = [1, 8, 8], strides = [1, 1, 1]} : vector<8x8x8xf32> to vector<1x8x8xf32>
    %294 = vector.shape_cast %293 : vector<1x8x8xf32> to vector<8x8xf32>
    %295 = tpu.concatenate %288, %290, %292, %294 in 1 : vector<8x8xf32>, vector<8x8xf32>, vector<8x8xf32>, vector<8x8xf32> -> vector<8x32xf32>
    %296 = tpu.concatenate %286, %295 in 0 : vector<8x32xf32>, vector<8x32xf32> -> vector<16x32xf32>
    %297 = arith.truncf %296 : vector<16x32xf32> to vector<16x32xbf16>
    %298 = vector.extract_strided_slice %10 {offsets = [3, 0, 0], sizes = [1, 32, 32], strides = [1, 1, 1]} : vector<4x32x32xbf16> to vector<1x32x32xbf16>
    %299 = vector.shape_cast %298 : vector<1x32x32xbf16> to vector<32x32xbf16>
    %cst_59 = arith.constant dense<0.000000e+00> : vector<16x32xf32>
    %300 = tpu.matmul %297, %299, %cst_59 {dimension_numbers = #tpu.dot_dimension_numbers<[1], [0], [0], [1], [0, 0, 1, 1], [], []>} : vector<16x32xbf16>, vector<32x32xbf16>, vector<16x32xf32> -> vector<16x32xf32>
    %301 = vector.extract_strided_slice %12 {offsets = [3, 0, 0], sizes = [1, 1, 32], strides = [1, 1, 1]} : vector<4x1x32xf32> to vector<1x1x32xf32>
    %302 = vector.shape_cast %301 : vector<1x1x32xf32> to vector<1x32xf32>
    %303 = vector.broadcast %302 : vector<1x32xf32> to vector<16x32xf32>
    %304 = arith.addf %300, %303 : vector<16x32xf32>
    %305 = arith.addf %304, %182 : vector<16x32xf32>
    %306 = vector.extract_strided_slice %14 {offsets = [0, 0], sizes = [1, 32], strides = [1, 1]} : vector<2x32xf32> to vector<1x32xf32>
    %307 = vector.extract_strided_slice %14 {offsets = [1, 0], sizes = [1, 32], strides = [1, 1]} : vector<2x32xf32> to vector<1x32xf32>
    %cst_60 = arith.constant dense<0.000000e+00> : vector<16xf32>
    %308 = vector.multi_reduction <add>, %305, %cst_60 [1] : vector<16x32xf32> to vector<16xf32>
    %309 = vector.shape_cast %308 : vector<16xf32> to vector<16x1xf32>
    %cst_61 = arith.constant 3.200000e+01 : f32
    %310 = vector.broadcast %cst_61 : f32 to vector<16x1xf32>
    %311 = arith.divf %309, %310 : vector<16x1xf32>
    %312 = vector.broadcast %311 : vector<16x1xf32> to vector<16x32xf32>
    %313 = arith.subf %305, %312 : vector<16x32xf32>
    %314 = arith.mulf %313, %313 : vector<16x32xf32>
    %cst_62 = arith.constant dense<0.000000e+00> : vector<16xf32>
    %315 = vector.multi_reduction <add>, %314, %cst_62 [1] : vector<16x32xf32> to vector<16xf32>
    %316 = vector.shape_cast %315 : vector<16xf32> to vector<16x1xf32>
    %cst_63 = arith.constant 3.200000e+01 : f32
    %317 = vector.broadcast %cst_63 : f32 to vector<16x1xf32>
    %318 = arith.divf %316, %317 : vector<16x1xf32>
    %319 = vector.broadcast %311 : vector<16x1xf32> to vector<16x32xf32>
    %320 = arith.subf %305, %319 : vector<16x32xf32>
    %cst_64 = arith.constant 9.99999974E-6 : f32
    %321 = vector.broadcast %cst_64 : f32 to vector<16x1xf32>
    %322 = arith.addf %318, %321 : vector<16x1xf32>
    %323 = math.rsqrt %322 : vector<16x1xf32>
    %324 = vector.broadcast %323 : vector<16x1xf32> to vector<16x32xf32>
    %325 = arith.mulf %320, %324 : vector<16x32xf32>
    %326 = vector.broadcast %306 : vector<1x32xf32> to vector<16x32xf32>
    %327 = arith.mulf %325, %326 : vector<16x32xf32>
    %328 = vector.broadcast %307 : vector<1x32xf32> to vector<16x32xf32>
    %329 = arith.addf %327, %328 : vector<16x32xf32>
    %330 = arith.truncf %329 : vector<16x32xf32> to vector<16x32xbf16>
    %cst_65 = arith.constant dense<0.000000e+00> : vector<16x64xf32>
    %331 = tpu.matmul %330, %16, %cst_65 {dimension_numbers = #tpu.dot_dimension_numbers<[1], [0], [0], [1], [0, 0, 1, 1], [], []>} : vector<16x32xbf16>, vector<32x64xbf16>, vector<16x64xf32> -> vector<16x64xf32>
    %332 = vector.broadcast %18 : vector<1x64xf32> to vector<16x64xf32>
    %333 = arith.addf %331, %332 : vector<16x64xf32>
    %cst_66 = arith.constant 0.000000e+00 : f32
    %334 = vector.broadcast %cst_66 : f32 to vector<16x64xf32>
    %335 = arith.maximumf %333, %334 : vector<16x64xf32>
    %336 = arith.truncf %335 : vector<16x64xf32> to vector<16x64xbf16>
    %cst_67 = arith.constant dense<0.000000e+00> : vector<16x32xf32>
    %337 = tpu.matmul %336, %20, %cst_67 {dimension_numbers = #tpu.dot_dimension_numbers<[1], [0], [0], [1], [0, 0, 1, 1], [], []>} : vector<16x64xbf16>, vector<64x32xbf16>, vector<16x32xf32> -> vector<16x32xf32>
    %338 = vector.broadcast %22 : vector<1x32xf32> to vector<16x32xf32>
    %339 = arith.addf %337, %338 : vector<16x32xf32>
    %340 = arith.addf %339, %329 : vector<16x32xf32>
    %341 = vector.extract_strided_slice %14 {offsets = [0, 0], sizes = [1, 32], strides = [1, 1]} : vector<2x32xf32> to vector<1x32xf32>
    %342 = vector.extract_strided_slice %14 {offsets = [1, 0], sizes = [1, 32], strides = [1, 1]} : vector<2x32xf32> to vector<1x32xf32>
    %cst_68 = arith.constant dense<0.000000e+00> : vector<16xf32>
    %343 = vector.multi_reduction <add>, %340, %cst_68 [1] : vector<16x32xf32> to vector<16xf32>
    %344 = vector.shape_cast %343 : vector<16xf32> to vector<16x1xf32>
    %cst_69 = arith.constant 3.200000e+01 : f32
    %345 = vector.broadcast %cst_69 : f32 to vector<16x1xf32>
    %346 = arith.divf %344, %345 : vector<16x1xf32>
    %347 = vector.broadcast %346 : vector<16x1xf32> to vector<16x32xf32>
    %348 = arith.subf %340, %347 : vector<16x32xf32>
    %349 = arith.mulf %348, %348 : vector<16x32xf32>
    %cst_70 = arith.constant dense<0.000000e+00> : vector<16xf32>
    %350 = vector.multi_reduction <add>, %349, %cst_70 [1] : vector<16x32xf32> to vector<16xf32>
    %351 = vector.shape_cast %350 : vector<16xf32> to vector<16x1xf32>
    %cst_71 = arith.constant 3.200000e+01 : f32
    %352 = vector.broadcast %cst_71 : f32 to vector<16x1xf32>
    %353 = arith.divf %351, %352 : vector<16x1xf32>
    %354 = vector.broadcast %346 : vector<16x1xf32> to vector<16x32xf32>
    %355 = arith.subf %340, %354 : vector<16x32xf32>
    %cst_72 = arith.constant 9.99999974E-6 : f32
    %356 = vector.broadcast %cst_72 : f32 to vector<16x1xf32>
    %357 = arith.addf %353, %356 : vector<16x1xf32>
    %358 = math.rsqrt %357 : vector<16x1xf32>
    %359 = vector.broadcast %358 : vector<16x1xf32> to vector<16x32xf32>
    %360 = arith.mulf %355, %359 : vector<16x32xf32>
    %361 = vector.broadcast %341 : vector<1x32xf32> to vector<16x32xf32>
    %362 = arith.mulf %360, %361 : vector<16x32xf32>
    %363 = vector.broadcast %342 : vector<1x32xf32> to vector<16x32xf32>
    %364 = arith.addf %362, %363 : vector<16x32xf32>
    %c0_73 = arith.constant 0 : index
    %c0_74 = arith.constant 0 : index
    %365 = vector.load %arg15[%c0_73, %c0_74] : memref<16x32xf32, #tpu.memory_space<vmem>>, vector<16x32xf32>
    tpu.vector_store %arg15[%c0_73, %c0_74], %364 {strides = array<i32>} : memref<16x32xf32, #tpu.memory_space<vmem>>, vector<16x32xf32>,
    %c1_i32 = arith.constant 1 : i32
    %366 = arith.cmpi eq, %arg1, %c1_i32 : i32
    %367 = arith.extui %366 : i1 to i32
    %c0_i32_75 = arith.constant 0 : i32
    %368 = arith.cmpi ne, %367, %c0_i32_75 : i32
    scf.if %368 {
      %c0_76 = arith.constant 0 : index
      %c0_77 = arith.constant 0 : index
      %369 = vector.load %arg14[%c0_76, %c0_77] : memref<16x32xf32, #tpu.memory_space<vmem>>, vector<16x32xf32>
      tpu.vector_store %arg14[%c0_76, %c0_77], %364 {strides = array<i32>} : memref<16x32xf32, #tpu.memory_space<vmem>>, vector<16x32xf32>,
    } else {
    }
    return
  }
  func.func @transform_0(%arg0: i32, %arg1: i32) -> (i32, i32) {
    %c0_i32 = arith.constant 0 : i32
    %c0_i32_0 = arith.constant 0 : i32
    return %arg0, %c0_i32 : i32, i32
  }
  func.func @transform_1(%arg0: i32, %arg1: i32) -> (i32, i32) {
    %c0_i32 = arith.constant 0 : i32
    %c0_i32_0 = arith.constant 0 : i32
    return %arg0, %c0_i32 : i32, i32
  }
  func.func @transform_2(%arg0: i32, %arg1: i32) -> (i32, i32, i32, i32) {
    %c0_i32 = arith.constant 0 : i32
    %c0_i32_0 = arith.constant 0 : i32
    %c0_i32_1 = arith.constant 0 : i32
    %c0_i32_2 = arith.constant 0 : i32
    return %arg1, %c0_i32, %c0_i32_0, %c0_i32_1 : i32, i32, i32, i32
  }
  func.func @transform_3(%arg0: i32, %arg1: i32) -> (i32, i32, i32, i32) {
    %c0_i32 = arith.constant 0 : i32
    %c0_i32_0 = arith.constant 0 : i32
    %c0_i32_1 = arith.constant 0 : i32
    %c0_i32_2 = arith.constant 0 : i32
    return %arg1, %c0_i32, %c0_i32_0, %c0_i32_1 : i32, i32, i32, i32
  }
  func.func @transform_4(%arg0: i32, %arg1: i32) -> (i32, i32, i32) {
    %c0_i32 = arith.constant 0 : i32
    %c0_i32_0 = arith.constant 0 : i32
    %c0_i32_1 = arith.constant 0 : i32
    return %arg1, %c0_i32, %c0_i32_0 : i32, i32, i32
  }
  func.func @transform_5(%arg0: i32, %arg1: i32) -> (i32, i32, i32, i32) {
    %c0_i32 = arith.constant 0 : i32
    %c0_i32_0 = arith.constant 0 : i32
    %c0_i32_1 = arith.constant 0 : i32
    %c0_i32_2 = arith.constant 0 : i32
    return %arg1, %c0_i32, %c0_i32_0, %c0_i32_1 : i32, i32, i32, i32
  }
  func.func @transform_6(%arg0: i32, %arg1: i32) -> (i32, i32, i32, i32) {
    %c0_i32 = arith.constant 0 : i32
    %c0_i32_0 = arith.constant 0 : i32
    %c0_i32_1 = arith.constant 0 : i32
    %c0_i32_2 = arith.constant 0 : i32
    return %arg1, %c0_i32, %c0_i32_0, %c0_i32_1 : i32, i32, i32, i32
  }
  func.func @transform_7(%arg0: i32, %arg1: i32) -> (i32, i32, i32) {
    %c0_i32 = arith.constant 0 : i32
    %c0_i32_0 = arith.constant 0 : i32
    %c0_i32_1 = arith.constant 0 : i32
    return %arg1, %c0_i32, %c0_i32_0 : i32, i32, i32
  }
  func.func @transform_8(%arg0: i32, %arg1: i32) -> (i32, i32, i32) {
    %c0_i32 = arith.constant 0 : i32
    %c0_i32_0 = arith.constant 0 : i32
    %c0_i32_1 = arith.constant 0 : i32
    return %arg1, %c0_i32, %c0_i32_0 : i32, i32, i32
  }
  func.func @transform_9(%arg0: i32, %arg1: i32) -> (i32, i32, i32) {
    %c0_i32 = arith.constant 0 : i32
    %c0_i32_0 = arith.constant 0 : i32
    %c0_i32_1 = arith.constant 0 : i32
    return %arg1, %c0_i32, %c0_i32_0 : i32, i32, i32
  }
  func.func @transform_10(%arg0: i32, %arg1: i32) -> (i32, i32, i32) {
    %c0_i32 = arith.constant 0 : i32
    %c0_i32_0 = arith.constant 0 : i32
    %c0_i32_1 = arith.constant 0 : i32
    return %arg1, %c0_i32, %c0_i32_0 : i32, i32, i32
  }
  func.func @transform_11(%arg0: i32, %arg1: i32) -> (i32, i32, i32) {
    %c0_i32 = arith.constant 0 : i32
    %c0_i32_0 = arith.constant 0 : i32
    %c0_i32_1 = arith.constant 0 : i32
    return %arg1, %c0_i32, %c0_i32_0 : i32, i32, i32
  }
  func.func @transform_12(%arg0: i32, %arg1: i32) -> (i32, i32) {
    %c0_i32 = arith.constant 0 : i32
    %c0_i32_0 = arith.constant 0 : i32
    return %arg0, %c0_i32 : i32, i32
  }
}

</mosaic_0001>

<bundles_post_ra>
// kernel: tpu_custom_call.1
= control target key start
LH: loop header
LB: loop body
LE: loop exit
PB: predicated region body
PF: predicated region fallthrough
CT: control target
= control target key end

     0   :  { %s5265_s0 = inlined_call_operand.vmem [shape: f32[16,32], index: 0, kind: input, shape index: {}]   ;;  %s5266_s1 = inlined_call_operand.vmem [shape: bf16[16,32], index: 1, kind: input, shape index: {}]   ;;  %s5267_s2 = inlined_call_operand.hbm [shape: bf16[2,4,32,32], index: 2, kind: input, shape index: {}]   ;;  %s5268_s3 = inlined_call_operand.vmem [shape: f32[2,4,1,32], index: 3, kind: input, shape index: {}]   ;;  %s5269_s4 = inlined_call_operand.vmem [shape: f32[2,2,32], index: 4, kind: input, shape index: {}]   ;;  %s5270_s5 = inlined_call_operand.hbm [shape: bf16[2,4,32,32], index: 5, kind: input, shape index: {}]   ;;  %s5271_s6 = inlined_call_operand.vmem [shape: f32[2,4,1,32], index: 6, kind: input, shape index: {}]   ;;  %s5272_s7 = inlined_call_operand.vmem [shape: f32[2,2,32], index: 7, kind: input, shape index: {}]   ;;  %s5273_s8 = inlined_call_operand.vmem [shape: bf16[2,32,64], index: 8, kind: input, shape index: {}]   ;;  %s5274_s9 = inlined_call_operand.vmem [shape: f32[2,1,64], index: 9, kind: input, shape index: {}]   ;;  %s5275_s10 = inlined_call_operand.vmem [shape: bf16[2,64,32], index: 10, kind: input, shape index: {}]   ;;  %s5276_s11 = inlined_call_operand.vmem [shape: f32[2,1,32], index: 11, kind: input, shape index: {}]   ;;  %s5277_s12 = inlined_call_operand.hbm [shape: f32[16,32], index: 12, kind: output, shape index: {}]  }
   0x1   :  { %5289 = sst [smem:[#allocation18_spill]] %s5267_s2 }
   0x2   :  { %5290 = sst [smem:[#allocation19_spill]] %s5268_s3 }
   0x3   :  { %5291 = sst [smem:[#allocation20_spill]] %s5269_s4 }
   0x4   :  { %5292 = sst [smem:[#allocation21_spill]] %s5270_s5 }
   0x5   :  { %5293 = sst [smem:[#allocation22_spill]] %s5277_s12 }
   0x6   :  { %17 = vsyncpa [#allocation4], 0 }
   0x7   :  { %19 = vsyncpa [#allocation4 + $0x1], 0 }
   0x8   :  { %20 = vsyncpa [#allocation7], 0 }
   0x9   :  { %22 = vsyncpa [#allocation7 + $0x1], 0 }
   0xa   :  { %23 = vsyncpa [#allocation5], 0  ;;  %s4518_s21 = smov 0   ;;  %s4520_s22 = smov 0  }
   0xb   :  { %s4522_s23 = smov 0   ;;  %s4524_s24 = smov 0  }
   0xc   :  { %s4526_s25 = smov 0   ;;  %s4528_s26 = smov 0  }
   0xd LB: > { %5294 = sst [smem:[#allocation12_spill]] %s4420_s22  ;;  %s5278_s27 = sadd.s32 4294967295, %s4436_s26   ;;  %s4436_s26 = sphi %s4528_s26, %s29_s26   ;;  %s4432_s25 = sphi %s4526_s25, %s5322_s25   ;;  %s4428_s24 = sphi %s4524_s24, %s5321_s24   ;;  %s4424_s23 = sphi %s4522_s23, %s5320_s23   ;;  %s4420_s22 = sphi %s4520_s22, %s5319_s22   ;;  %s4416_s21 = sphi %s4518_s21, %s5318_s21  }
   0xe   : > { %5295 = sst [smem:[#allocation13_spill]] %s4424_s23  ;;  %s38_s28 = sadd.s32 1, %s4432_s25 }
   0xf   : > { %5296 = sst [smem:[#allocation14_spill]] %s4432_s25  ;;  %p39_p0 = scmp.ge.s32.totalorder %s38_s28, 2 }
  0x10   : > { %5297 = sst [smem:[#allocation15_spill]] %s4436_s26  ;;  %s100_s29 = sadd.s32 1, %s4424_s23 }
  0x11   : > { %p107_p1 = scmp.ne.s32.totalorder %s4424_s23, %s4420_s22  ;;  %p108_p2 = scmp.eq.s32.totalorder %s4436_s26, 0 }
  0x12   : > { %s5324_s28 = smov (%p39_p0, %s38_s28), 0  ;;  %p113_p4 = scmp.ne.s32.totalorder %s4420_s22, %s4416_s21 }
  0x13   : > { %5298 = sst [smem:[#allocation16_spill]] %s5324_s28  ;;  %p4554_p3 = por %p108_p2, %p107_p1 }
  0x14   : > { %s97_s13 = ssub.s32 %s4432_s25, %s5324_s28  ;;  %p114_p5 = scmp.eq.s32.totalorder %s5278_s27, 0 }
  0x15   : > { %p98_p6 = scmp.eq.s32.totalorder %s97_s13, 0  ;;  %p4099_p8 = scmp.lt.s32.totalorder %s4436_s26, 2 }
  0x16   : > { %p4563_p7 = por %p114_p5, %p113_p4  ;;  %s4572_s16 = sand.u32 1, %s4424_s23  }
  0x17   : > { %s4569_s15 = scalar_select %p98_p6, %s4424_s23, %s100_s29  }
  0x18   : > { %s5300_s14 = scalar_select %p4563_p7, 1, 0 }
  0x19   : > { %5301 = sst [smem:[#allocation17_spill]] %s4569_s15  ;;  %s5281_s17 = sshll.u32 %s4432_s25, 10 }
  0x1a   : > { %s5280_s18 = sshll.u32 %s4572_s16, 6  ;;  %s5302_s2 = sld [smem:[#allocation18_spill]] }
  0x1b   : > { %s419_s29 = scalar_lea.vmem [#allocation3], %s5280_s18  ;;  %p4587_p9 = pnand %p4099_p8, %p4554_p3 }
  0x1c   : > { %s426_s13 = sshll.u32 %s419_s29, 4  ;;  %s4591_s13 = int_to_ptr.vmem [resolvable:$true] %s426_s13 }
  0x1d   : > { %p4294_p11 = pneg %p4587_p9 }
  0x20   : > { %s4581_s21 = scalar_lea.hbm %s5302_s2, %s5281_s17  ;;  %s4297_s30 = scalar_lea.hbm %s5302_s2, 2048 }
  0x21   : > { %s4292_s19 = scalar_lea.hbm %s4581_s21, 1024  ;;  %p4298_p0 = scmp.lt.u32.totalorder %s4581_s21, %s5302_s2 }
  0x22   : > { %p4293_p10 = scmp.ne.s32.totalorder %s4581_s21, %s4292_s19  ;;  %p4299_p1 = scmp.lt.u32.totalorder %s4297_s30, %s4292_s19 }
  0x23   : > { %p4301_p3 = scmp.lt.u32.totalorder %s4292_s19, %s4581_s21 }
  0x24   : > { %p4295_p12 = pnand %p4294_p11, %p4293_p10  ;;  %p4300_p2 = por %p4299_p1, %p4298_p0 }
  0x26   : > { %p4296_p13 = pneg %p4295_p12  ;;  %p4302_p4 = por %p4301_p3, %p4300_p2 }
  0x28   : > { %p4303_p5 = pnand %p4302_p4, %p4296_p13 }
  0x2a   : > { %4306 = shalt.err (!%p4303_p5)
}
  0x2b   : > { %s4307_s28 = scalar_lea.vmem %s4591_s13, 1024  ;;  %s4438_s20 = smov [#allocation3]  }
  0x2c   : > { %p4308_p6 = scmp.ne.s32.totalorder %s4591_s13, %s4307_s28  ;;  %s4312_s29 = sshll.u32 %s4438_s20, 4  ;;  %s4313_s29 = int_to_ptr.vmem [resolvable:$false] %s4312_s29 }
  0x2d   : > { %s4314_s17 = scalar_lea.vmem %s4313_s29, 2048  ;;  %p4315_p12 = scmp.lt.s32.totalorder %s4591_s13, %s4313_s29 }
  0x2e   : > { %p4310_p8 = pnand %p4308_p6, %p4294_p11  ;;  %p4316_p0 = scmp.lt.s32.totalorder %s4314_s17, %s4307_s28 }
  0x30   : > { %p4311_p10 = pneg %p4310_p8  ;;  %p4317_p1 = por %p4316_p0, %p4315_p12 }
  0x32   : > { %p4318_p2 = pnand %p4317_p1, %p4311_p10 }
  0x34   : > { %4321 = shalt.err (!%p4318_p2)
}
  0x35   : > { %s5284_s18 = smov 64   ;;  %s4440_s19 = smov 4  }
  0x36   : > { %s5304_s28 = scalar_lea.sflag [#allocation4], %s4572_s16  ;;  %p3616_p13 = scmp.ge.s32.totalorder %s4436_s26, 1 }
  0x37   : > { %4095 = dma.hbm_to_vmem [thread:$0]  (!%p4587_p9), %s4581_s21, 1024, %s4591_s13, %s5304_s28, %s5284_s18, %s5284_s18, %s4440_s19  }
  0x38   : > { %p511_p3 = scmp.lt.s32.totalorder %s4436_s26, 3  ;;  %s5306_s20 = sshll.u32 %s4432_s25, 10 }
  0x39   : > { %s5307_s5 = sld [smem:[#allocation21_spill]]  ;;  %s5308_s15 = sshll.u32 %s4572_s16, 6 }
  0x3a   : > { %p4626_p4 = pnand %p3616_p13, %p511_p3  ;;  %s454_s23 = scalar_lea.vmem [#allocation6], %s5308_s15 }
  0x3b   : > { %s461_s12 = sshll.u32 %s454_s23, 4  ;;  %s451_s21 = scalar_lea.sflag [#allocation7], %s4572_s16  ;;  %s4639_s12 = int_to_ptr.vmem [resolvable:$true] %s461_s12 }
  0x3f   : > { %s4635_s2 = scalar_lea.hbm %s5307_s5, %s5306_s20  ;;  %s4327_s20 = scalar_lea.hbm %s5307_s5, 2048 }
  0x40   : > { %s4322_s13 = scalar_lea.hbm %s4635_s2, 1024  ;;  %p4328_p10 = scmp.lt.u32.totalorder %s4635_s2, %s5307_s5 }
  0x41   : > { %p4323_p5 = scmp.ne.s32.totalorder %s4635_s2, %s4322_s13  ;;  %p4329_p12 = scmp.lt.u32.totalorder %s4327_s20, %s4322_s13 }
  0x42   : > { %p4331_p1 = scmp.lt.u32.totalorder %s4322_s13, %s4635_s2 }
  0x43   : > { %p4325_p6 = pnand %p4323_p5, %p4294_p11  ;;  %p4330_p0 = por %p4329_p12, %p4328_p10 }
  0x45   : > { %p4326_p8 = pneg %p4325_p6  ;;  %p4332_p2 = por %p4331_p1, %p4330_p0 }
  0x47   : > { %p4333_p13 = pnand %p4332_p2, %p4326_p8 }
  0x49   : > { %4336 = shalt.err (!%p4333_p13)
}
  0x4a   : > { %s4337_s23 = scalar_lea.vmem %s4639_s12, 1024  ;;  %s4441_s15 = smov [#allocation6]  }
  0x4b   : > { %p4338_p3 = scmp.ne.s32.totalorder %s4639_s12, %s4337_s23  ;;  %s4342_s28 = sshll.u32 %s4441_s15, 4  ;;  %s4343_s28 = int_to_ptr.vmem [resolvable:$false] %s4342_s28 }
  0x4c   : > { %s4344_s18 = scalar_lea.vmem %s4343_s28, 2048  ;;  %p4345_p7 = scmp.lt.s32.totalorder %s4639_s12, %s4343_s28 }
  0x4d   : > { %p4340_p5 = pnand %p4338_p3, %p4294_p11  ;;  %p4346_p10 = scmp.lt.s32.totalorder %s4344_s18, %s4337_s23 }
  0x4f   : > { %p4341_p6 = pneg %p4340_p5  ;;  %p4347_p12 = por %p4346_p10, %p4345_p7 }
  0x51   : > { %p4348_p0 = pnand %p4347_p12, %p4341_p6 }
  0x53   : > { %4351 = shalt.err (!%p4348_p0)
}
  0x54   : > { %s5309_s13 = smov 64   ;;  %515 = sbr.rel (%p4626_p4) target bundleno = 4426 (0x114a), region = 68 }
  0x55   : > { %4098 = dma.hbm_to_vmem [thread:$0]  (!%p4587_p9), %s4635_s2, 1024, %s4639_s12, %s451_s21, %s5309_s13, %s5309_s13, %s4440_s19  }
  0x56   : > { %s517_s29 = sand.u32 (!%p4626_p4), 1, %s4420_s22   ;;  %p5310_p7 = scmp.ne.s32.totalorder (!%p4626_p4), %s5300_s14, 0 }
  0x57   : > { %s3617_s20 = sshll.u32 (!%p4626_p4), %s517_s29, 6  ;;  %s518_s17 = scalar_lea.sflag (!%p4626_p4), [#allocation4], %s517_s29 }
  0x58   : > { %s4673_s23 = scalar_lea.vmem (!%p4626_p4), [#allocation3], %s3617_s20 }
  0x5b   : > { %4403 = dma.done.wait (%p5310_p7), %s518_s17, 1024  }
  0x5c   : > { %4405 = vsyncadd (%p5310_p7), %s518_s17, 4294966272  ;;  %s527_s27 = scalar_lea.sflag [#allocation7], %s517_s29  ;;  %s4679_s16 = scalar_lea.vmem [#allocation6], %s3617_s20 }
  0x5d   : > { %4407 = dma.done.wait (%p5310_p7), %s527_s27, 1024  }
  0x5e   : > { %4409 = vsyncadd (%p5310_p7), %s527_s27, 4294966272  ;;  %p625_p9 = scmp.lt.s32.totalorder %s4428_s24, 1  ;;  %s5311_s3 = sld [smem:[#allocation19_spill]] }
  0x5f   : > { %s5312_s4 = sld [smem:[#allocation20_spill]]  ;;  %p3627_p11 = scmp.ne.s32.totalorder %s4428_s24, 0 }
  0x60   : > { %s4687_s2 = scalar_select %p625_p9, %s4428_s24, 1 }
  0x61   : > { %662 = sbr.rel (%p3627_p11) target bundleno = 104 (0x68), region = 80  ;;  %v663_v0 = vld [vmem:[%s5265_s0] sm:$0xff] (!%p3627_p11)  ;;  %vm665_vm0 = vcmask (!%p3627_p11), 261120   ;;  %v664_v1 = vld [vmem:[%s5265_s0 + $0x8] sm:$0xff] (!%p3627_p11) }
  0x62   : > { %s3619_s12 = sshll.u32 %s4687_s2, 2  ;;  %s3620_s19 = sshll.u32 %s4687_s2, 1  ;;  %666 = vst.msk [vmem:[#allocation2] sm:$0xff] (!%p3627_p11), %vm665_vm0, %v663_v0  ;;  %667 = vst.msk [vmem:[#allocation2 + $0x8] sm:$0xff] (!%p3627_p11), %vm665_vm0, %v664_v1 }
  0x63   : > { %s4704_s20 = scalar_lea.vmem %s5271_s6, %s3619_s12  ;;  %s4709_s5 = scalar_lea.vmem %s5272_s7, %s3620_s19 }
  0x64   : > { %s4694_s15 = scalar_lea.vmem %s5311_s3, %s3619_s12  ;;  %s3710_s25 = sshll.u32 %s4687_s2, 4 }
  0x65   : > { %s4699_s18 = scalar_lea.vmem %s5312_s4, %s3620_s19  ;;  %s648_s21 = scalar_lea.vmem %s5274_s9, %s4687_s2 }
  0x66   : > { %s4719_s14 = scalar_lea.vmem %s5273_s8, %s3710_s25  ;;  %s3711_s28 = sshll.u32 %s4687_s2, 5 }
  0x67   : > { %s4725_s12 = scalar_lea.vmem %s5275_s10, %s3711_s28  ;;  %s656_s19 = scalar_lea.vmem %s5276_s11, %s4687_s2 }
  0x68 PF: > { %v4193_v2 = vld [vmem:[%s4673_s23] sm:$0xff]   ;;  %v4442_v3 = vmov 0.0   ;;  %v4194_v4 = vld [vmem:[%s4673_s23 + $0x10] sm:$0xff]   ;;  %v4195_v5 = vld [vmem:[%s4673_s23 + $0x8] sm:$0xff]   ;;  %vm4443_vm1 = vmmov 0   ;;  %vm747_vm2 = vcmask 261120  }
  0x69   : > { %3808 = vmatprep.subr.bf16.mxu0 %v4442_v3  ;;  %3816 = vmatprep.subr.bf16.mxu1 %v4442_v3  ;;  %v4196_v6 = vld [vmem:[%s4673_s23 + $0x18] sm:$0xff]   ;;  %v4750_v7 = vld [vmem:[#allocation2] sm:$0xff]  ;;  %v4197_v10 = vld [vmem:[%s4673_s23 + $0x20] sm:$0xff]   ;;  %s4444_s4 = smov 120   ;;  %vm1000_vm3 = vcmask 64512   ;;  %s4445_s26 = smov 104  }
  0x6a   : > { %3809 = vmatpush3.bf16.msra.mxu0 %v4193_v2  ;;  %3812 = vmatprep.mubr.msk.bf16.mxu0 %vm4443_vm1, %v4442_v3  ;;  %v4752_v8 = vld [vmem:[#allocation2 + $0x8] sm:$0xff]  ;;  %v4198_v11 = vld [vmem:[%s4673_s23 + $0x28] sm:$0xff]   ;;  %v3628_v12 = vld [vmem:[%s4694_s15] ss:$0 sm:$0xff]  ;;  %s4446_s30 = smov 112   ;;  %vm1468_vm4 = vcmask 1043456  }
  0x6b   : > { %3817 = vmatpush3.bf16.msra.mxu1 %v4194_v4  ;;  %3810 = vmatprep.subr.bf16.mxu0 %v4442_v3  ;;  %v728_v9 = vpack.c.bf16 %v4752_v8, %v4750_v7  ;;  %v3632_v13 = vld [vmem:[%s4694_s15 + $0x1] ss:$0 sm:$0xff]  ;;  %v3636_v29 = vld [vmem:[%s4694_s15 + $0x2] ss:$0 sm:$0xff]  ;;  %s4448_s28 = smov 8   ;;  %s4449_s13 = smov 24  }
  0x6c   : > { %3818 = vmatprep.subr.bf16.mxu1 %v4442_v3  ;;  %3820 = vmatprep.mubr.msk.bf16.mxu1 %vm4443_vm1, %v4442_v3  ;;  %s4450_s29 = smov 16   ;;  %vm1847_vm6 = vcmask 130048   ;;  %vm1849_vm7 = vcmask 195584   ;;  %vm3304_vm8 = vcmask 523264   ;;  %p3703_p4 = scmp.ne.s32.totalorder %s4428_s24, 1 }
  0x6e   : > { %3811 = vmatpush3.bf16.msra.mxu0 %v4195_v5 }
  0x6f   : > { %3819 = vmatpush3.bf16.msra.mxu1 %v4196_v6  ;;  %3824 = vmatprep.subr.bf16.mxu0 %v4442_v3 }
  0x70   : > { %3832 = vmatprep.subr.bf16.mxu1 %v4442_v3 }
  0x71   : > { %3813 = vmatmul.mubr.msk.bf16.vlgmr.msra.gmra.mrb[0].mxu0 %vm747_vm2, %v728_v9 }
  0x72   : > { %3821 = vmatmul.mubr.msk.bf16.vlgmr.msra.gmra.mrb[0].mxu1 %vm747_vm2, %v728_v9  ;;  %3828 = vmatprep.mubr.msk.bf16.mxu0 %vm4443_vm1, %v4442_v3 }
  0x73   : > { %3834 = vmatprep.mubr.msk.bf16.mxu1 %vm4443_vm1, %v4442_v3  ;;  %3825 = vmatpush3.bf16.msra.mxu0 %v4197_v10  ;;  %v994_v10 = vlaneseq }
  0x74   : > { %3826 = vmatprep.subr.bf16.mxu0 %v4442_v3 }
  0x77   : > { %3827 = vmatpush3.bf16.msra.mxu0 %v4198_v11  ;;  %v4834_v11 = vshrl.u32 %v994_v10, 7 }
  0x78   : > { %3838 = vmatprep.subr.bf16.mxu0 %v4442_v3 }
  0x7a   : > { %3829 = vmatmul.mubr.msk.bf16.vlgmr.msra.gmra.mrb[4].mxu0 %vm747_vm2, %v728_v9 }
  0x7b   : > { %3840 = vmatprep.mubr.msk.bf16.mxu0 %vm4443_vm1, %v4442_v3 }
 0x144   : > { %v785_v14 = vpop.f32.mrb[0].mxu0 }
 0x145   : > { %v786_v15 = vadd.f32 %v3628_v12, %v785_v14  ;;  %v844_v16 = vpop.f32.mrb[0].mxu1  ;;  %v3814_v17 = vpop.f32.mrb[1].mxu0 }
 0x146   : > { %v845_v18 = vadd.f32 %v3632_v13, %v844_v16  ;;  %v3822_v19 = vpop.f32.mrb[1].mxu1  ;;  %v788_v20 = vpop.f32.mrb[2].mxu0 }
 0x147   : > { %v847_v21 = vpop.f32.mrb[2].mxu1  ;;  %911 = vrot.lane.b32.xlu1 %v786_v15, %s4444_s4  ;;  %v3815_v22 = vpop.f32.mrb[3].mxu0  ;;  %v930_v26 = vpack.c.bf16 %v786_v15, %v786_v15  ;;  %v789_v28 = vadd.f32 %v3628_v12, %v788_v20  ;;  %v997_v12 = vand.u32 127, %v994_v10 }
 0x148   : > { %939 = vrot.lane.b32.xlu0 %v845_v18, %s4444_s4  ;;  %v3823_v23 = vpop.f32.mrb[3].mxu1  ;;  %v958_v24 = vpack.c.bf16 %v845_v18, %v845_v18  ;;  %v848_v27 = vadd.f32 %v3632_v13, %v847_v21  ;;  %v4447_v13 = vmov -1e+30  }
 0x149   : > { %v934_v59 = vpack.c.bf16 %v789_v28, %v789_v28  ;;  %vm998_vm5 = vcmp.ge.s32.totalorder %v4834_v11, %v997_v12 }
 0x14a   : > { %v1005_v25 = vsel %vm1000_vm3, %v958_v24, 0  ;;  %v962_v48 = vpack.c.bf16 %v848_v27, %v848_v27  ;;  %v999_v14 = vsel %vm998_vm5, 0.0, %v4447_v13 }
 0x14b   : > { %3833 = vmatpush3.bf16.xpose.msra.mxu1 %v1005_v25  ;;  %945 = vrot.lane.b32.xlu1 %v845_v18, %s4445_s26 }
 0x14c   : > { %942 = vrot.lane.b32.xlu0 %v845_v18, %s4446_s30  ;;  %3844 = vmatprep.subr.bf16.mxu1 %v4442_v3  ;;  %v1189_v53 = vsel %vm1000_vm3, %v962_v48, 0 }
 0x14d   : > { %v903_v30 = vpop.f32.mrb[4].mxu0 }
 0x14e   : > { %v3830_v32 = vpop.f32.mrb[5].mxu0  ;;  %v4812_v60 = vadd.f32 %v3636_v29, %v903_v30 }
 0x14f   : > { %917 = vrot.lane.b32.xlu1 %v786_v15, %s4445_s26  ;;  %v906_v34 = vpop.f32.mrb[6].mxu0 }
 0x150   : > { %914 = vrot.lane.b32.xlu0 %v786_v15, %s4446_s30  ;;  %v4791_v36 = vadd.f32 %v3636_v29, %v906_v34  ;;  %v3831_v37 = vpop.f32.mrb[7].mxu0  ;;  %v986_v0 = vpack.c.bf16 %v4812_v60, %v4812_v60 }
 0x152   : > { %3835 = vmatmul.mubr.msk.bf16.vlgmr.msra.gmra.mrb[4].mxu1 %vm1000_vm3, %v930_v26  ;;  %v1470_v5 = vsel %vm1468_vm4, %v986_v0, 0 }
 0x153   : > { %952 = vrot.lane.b32.xlu1 %v848_v27, %s4446_s30  ;;  %3846 = vmatprep.mubr.msk.bf16.mxu1 %vm4443_vm1, %v4442_v3 }
 0x154   : > { %949 = vrot.lane.b32.xlu0 %v848_v27, %s4444_s4 }
 0x157   : > { %955 = vrot.lane.b32.xlu1 %v848_v27, %s4445_s26 }
 0x158   : > { %921 = vrot.lane.b32.xlu0 %v789_v28, %s4444_s4 }
 0x15b   : > { %927 = vrot.lane.b32.xlu1 %v789_v28, %s4445_s26 }
 0x15c   : > { %924 = vrot.lane.b32.xlu0 %v789_v28, %s4446_s30 }
 0x1b9   : > { %v912_v31 = vpop.permute.xlu1 %911 }
 0x1ba   : > { %v940_v33 = vpop.permute.xlu0 %939  ;;  %v931_v46 = vpack.c.bf16 %v912_v31, %v912_v31 }
 0x1bb   : > { %v959_v35 = vpack.c.bf16 %v940_v33, %v940_v33 }
 0x1bd   : > { %v1051_v38 = vsel %vm1000_vm3, %v959_v35, 0  ;;  %v946_v39 = vpop.permute.xlu1 %945 }
 0x1be   : > { %v943_v40 = vpop.permute.xlu0 %942  ;;  %3839 = vmatpush3.bf16.xpose.msra.mxu0 %v1051_v38  ;;  %v961_v43 = vpack.c.bf16 %v946_v39, %v946_v39 }
 0x1bf   : > { %v960_v41 = vpack.c.bf16 %v943_v40, %v943_v40  ;;  %3850 = vmatprep.subr.bf16.mxu0 %v4442_v3 }
 0x1c0   : > { %v1143_v47 = vsel %vm1000_vm3, %v961_v43, 0 }
 0x1c1   : > { %v1097_v42 = vsel %vm1000_vm3, %v960_v41, 0  ;;  %v918_v45 = vpop.permute.xlu1 %917 }
 0x1c2   : > { %v915_v44 = vpop.permute.xlu0 %914  ;;  %3845 = vmatpush3.bf16.xpose.msra.mxu1 %v1097_v42  ;;  %v933_v54 = vpack.c.bf16 %v918_v45, %v918_v45 }
 0x1c3   : > { %3856 = vmatprep.subr.bf16.mxu1 %v4442_v3  ;;  %v932_v50 = vpack.c.bf16 %v915_v44, %v915_v44 }
 0x1c5   : > { %3841 = vmatmul.mubr.msk.bf16.vlgmr.msra.gmra.mrb[8].mxu0 %vm1000_vm3, %v931_v46  ;;  %v953_v51 = vpop.permute.xlu1 %952 }
 0x1c6   : > { %v950_v49 = vpop.permute.xlu0 %949  ;;  %3851 = vmatpush3.bf16.xpose.msra.mxu0 %v1143_v47  ;;  %3852 = vmatprep.mubr.msk.bf16.mxu0 %vm4443_vm1, %v4442_v3  ;;  %v964_v56 = vpack.c.bf16 %v953_v51, %v953_v51 }
 0x1c7   : > { %3862 = vmatprep.subr.bf16.mxu0 %v4442_v3  ;;  %v963_v52 = vpack.c.bf16 %v950_v49, %v950_v49 }
 0x1c8   : > { %v1281_v61 = vsel %vm1000_vm3, %v964_v56, 0 }
 0x1c9   : > { %3847 = vmatmul.mubr.msk.bf16.vlgmr.msra.gmra.mrb[8].mxu1 %vm1000_vm3, %v932_v50  ;;  %v1235_v55 = vsel %vm1000_vm3, %v963_v52, 0  ;;  %v956_v57 = vpop.permute.xlu1 %955 }
 0x1ca   : > { %3857 = vmatpush3.bf16.xpose.msra.mxu1 %v1189_v53  ;;  %3858 = vmatprep.mubr.msk.bf16.mxu1 %vm4443_vm1, %v4442_v3  ;;  %v922_v58 = vpop.permute.xlu0 %921  ;;  %v965_v62 = vpack.c.bf16 %v956_v57, %v956_v57 }
 0x1cb   : > { %3868 = vmatprep.subr.bf16.mxu1 %v4442_v3  ;;  %v935_v63 = vpack.c.bf16 %v922_v58, %v922_v58 }
 0x1cc   : > { %v1327_v2 = vsel %vm1000_vm3, %v965_v62, 0 }
 0x1cd   : > { %3853 = vmatmul.mubr.msk.bf16.vlgmr.msra.gmra.mrb[12].mxu0 %vm1000_vm3, %v933_v54  ;;  %v928_v6 = vpop.permute.xlu1 %927 }
 0x1ce   : > { %3863 = vmatpush3.bf16.xpose.msra.mxu0 %v1235_v55  ;;  %3864 = vmatprep.mubr.msk.bf16.mxu0 %vm4443_vm1, %v4442_v3  ;;  %v925_v1 = vpop.permute.xlu0 %924  ;;  %v937_v9 = vpack.c.bf16 %v928_v6, %v928_v6 }
 0x1cf   : > { %3874 = vmatprep.subr.bf16.mxu0 %v4442_v3  ;;  %v936_v4 = vpack.c.bf16 %v925_v1, %v925_v1 }
 0x1d1   : > { %3859 = vmatmul.mubr.msk.bf16.vlgmr.msra.gmra.mrb[12].mxu1 %vm1000_vm3, %v934_v59 }
 0x1d2   : > { %3869 = vmatpush3.bf16.xpose.msra.mxu1 %v1281_v61  ;;  %3870 = vmatprep.mubr.msk.bf16.mxu1 %vm4443_vm1, %v4442_v3 }
 0x1d3   : > { %3880 = vmatprep.subr.bf16.mxu1 %v4442_v3 }
 0x1d5   : > { %3865 = vmatmul.mubr.msk.bf16.vlgmr.msra.gmra.mrb[16].mxu0 %vm1000_vm3, %v935_v63 }
 0x1d6   : > { %3875 = vmatpush3.bf16.xpose.msra.mxu0 %v1327_v2  ;;  %3876 = vmatprep.mubr.msk.bf16.mxu0 %vm4443_vm1, %v4442_v3 }
 0x1d7   : > { %3886 = vmatprep.subr.bf16.mxu0 %v4442_v3 }
 0x1d9   : > { %3871 = vmatmul.mubr.msk.bf16.vlgmr.msra.gmra.mrb[16].mxu1 %vm1000_vm3, %v936_v4 }
 0x1da   : > { %3881 = vmatpush3.bf16.msra.mxu1 %v1470_v5  ;;  %3882 = vmatprep.mubr.msk.bf16.mxu1 %vm4443_vm1, %v4442_v3 }
 0x1db   : > { %3892 = vmatprep.subr.bf16.mxu1 %v4442_v3 }
 0x1dd   : > { %3877 = vmatmul.mubr.msk.bf16.vlgmr.msra.gmra.mrb[20].mxu0 %vm1000_vm3, %v937_v9 }
 0x1de   : > { %3888 = vmatprep.mubr.msk.bf16.mxu0 %vm4443_vm1, %v4442_v3 }
 0x225   : > { %v1041_v15 = vpop.f32.mrb[4].mxu1 }
 0x226   : > { %v1042_v16 = vadd.f32 %v1041_v15, %v999_v14  ;;  %v3836_v17 = vpop.f32.mrb[5].mxu1 }
 0x227   : > { %v1044_v18 = vpop.f32.mrb[6].mxu1 }
 0x228   : > { %v3837_v19 = vpop.f32.mrb[7].mxu1  ;;  %v1369_v20 = vsel %vm1000_vm3, %v1042_v16, -inf }
 0x229   : > { %1370 = vmax.xlane.f32.xlu0 %v1369_v20 }
 0x298   : > { %v1087_v21 = vpop.f32.mrb[8].mxu0 }
 0x299   : > { %v1088_v22 = vadd.f32 %v1087_v21, %v999_v14  ;;  %v3842_v23 = vpop.f32.mrb[9].mxu0 }
 0x29a   : > { %v1090_v24 = vpop.f32.mrb[10].mxu0 }
 0x29b   : > { %v3843_v25 = vpop.f32.mrb[11].mxu0  ;;  %v1372_v26 = vsel %vm1000_vm3, %v1088_v22, -inf }
 0x29c   : > { %v1133_v27 = vpop.f32.mrb[8].mxu1  ;;  %1373 = vmax.xlane.f32.xlu1 %v1372_v26 }
 0x29d   : > { %v1134_v28 = vadd.f32 %v1133_v27, %v999_v14  ;;  %v3848_v29 = vpop.f32.mrb[9].mxu1 }
 0x29e   : > { %v1136_v30 = vpop.f32.mrb[10].mxu1 }
 0x29f   : > { %v3849_v31 = vpop.f32.mrb[11].mxu1  ;;  %v1375_v32 = vsel %vm1000_vm3, %v1134_v28, -inf }
 0x2a0   : > { %1376 = vmax.xlane.f32.xlu0 %v1375_v32  ;;  %v1179_v33 = vpop.f32.mrb[12].mxu0 }
 0x2a1   : > { %v1180_v34 = vadd.f32 %v1179_v33, %v999_v14  ;;  %v3854_v35 = vpop.f32.mrb[13].mxu0 }
 0x2a2   : > { %v1182_v37 = vpop.f32.mrb[14].mxu0 }
 0x2a3   : > { %v3855_v38 = vpop.f32.mrb[15].mxu0  ;;  %v1378_v39 = vsel %vm1000_vm3, %v1180_v34, -inf }
 0x2a4   : > { %v1225_v40 = vpop.f32.mrb[12].mxu1  ;;  %1379 = vmax.xlane.f32.xlu0 %v1378_v39 }
 0x2a5   : > { %v1226_v41 = vadd.f32 %v1225_v40, %v999_v14  ;;  %v3860_v42 = vpop.f32.mrb[13].mxu1 }
 0x2a6   : > { %v1228_v43 = vpop.f32.mrb[14].mxu1 }
 0x2a7   : > { %v3861_v44 = vpop.f32.mrb[15].mxu1  ;;  %v1381_v45 = vsel %vm1000_vm3, %v1226_v41, -inf }
 0x2a8   : > { %1382 = vmax.xlane.f32.xlu1 %v1381_v45  ;;  %v1271_v46 = vpop.f32.mrb[16].mxu0 }
 0x2a9   : > { %v1272_v47 = vadd.f32 %v1271_v46, %v999_v14  ;;  %v3866_v48 = vpop.f32.mrb[17].mxu0 }
 0x2aa   : > { %v1274_v49 = vpop.f32.mrb[18].mxu0 }
 0x2ab   : > { %v3867_v50 = vpop.f32.mrb[19].mxu0  ;;  %v1384_v51 = vsel %vm1000_vm3, %v1272_v47, -inf }
 0x2ac   : > { %v1317_v52 = vpop.f32.mrb[16].mxu1  ;;  %1385 = vmax.xlane.f32.xlu0 %v1384_v51 }
 0x2ad   : > { %v1318_v53 = vadd.f32 %v1317_v52, %v999_v14  ;;  %v3872_v54 = vpop.f32.mrb[17].mxu1 }
 0x2ae   : > { %v1320_v55 = vpop.f32.mrb[18].mxu1 }
 0x2af   : > { %v3873_v56 = vpop.f32.mrb[19].mxu1  ;;  %v1387_v57 = vsel %vm1000_vm3, %v1318_v53, -inf }
 0x2b0   : > { %1388 = vmax.xlane.f32.xlu1 %v1387_v57  ;;  %v1363_v58 = vpop.f32.mrb[20].mxu0 }
 0x2b1   : > { %v1364_v59 = vadd.f32 %v1363_v58, %v999_v14  ;;  %v3878_v61 = vpop.f32.mrb[21].mxu0 }
 0x2b2   : > { %v1366_v62 = vpop.f32.mrb[22].mxu0 }
 0x2b3   : > { %v3879_v63 = vpop.f32.mrb[23].mxu0  ;;  %v1390_v0 = vsel %vm1000_vm3, %v1364_v59, -inf }
 0x2b4   : > { %1391 = vmax.xlane.f32.xlu0 %v1390_v0 }
 0x2b6   : > { %v1371_v1 = vpop.xlane.xlu0 %1370 }
 0x2b7   : > { %v1393_v2 = vsub.f32 %v1042_v16, %v1371_v1 }
 0x2b9   : > { %v1401_v4 = vmul.f32 1.442695, %v1393_v2 }
 0x2bb   : > { %4216 = vpow2.f32 %v1401_v4 }
 0x2c1   : > { %967 = vrot.lane.b32.xlu1 %v4812_v60, %s4444_s4 }
 0x2c5   : > { %v4847_v5 = vpop.eup %4216 }
 0x2c6   : > { %v1417_v6 = vsel %vm1000_vm3, %v4847_v5, 0.0 }
 0x2e5   : > { %1418 = vadd.xlane.f32.xlu1 %v1417_v6 }
 0x329   : > { %v1374_v9 = vpop.xlane.xlu1 %1373 }
 0x32a   : > { %v1394_v10 = vsub.f32 %v1088_v22, %v1374_v9 }
 0x32c   : > { %v1403_v12 = vmul.f32 1.442695, %v1394_v10 }
 0x32d   : > { %v1377_v13 = vpop.xlane.xlu0 %1376 }
 0x32e   : > { %4218 = vpow2.f32 %v1403_v12  ;;  %v1395_v14 = vsub.f32 %v1134_v28, %v1377_v13 }
 0x330   : > { %v1405_v15 = vmul.f32 1.442695, %v1395_v14 }
 0x331   : > { %v1380_v17 = vpop.xlane.xlu0 %1379 }
 0x332   : > { %4220 = vpow2.f32 %v1405_v15  ;;  %v1396_v18 = vsub.f32 %v1180_v34, %v1380_v17 }
 0x334   : > { %v1407_v19 = vmul.f32 1.442695, %v1396_v18 }
 0x335   : > { %v1383_v16 = vpop.xlane.xlu1 %1382 }
 0x336   : > { %4222 = vpow2.f32 %v1407_v19  ;;  %v1397_v20 = vsub.f32 %v1226_v41, %v1383_v16 }
 0x338   : > { %v4219_v21 = vpop.eup %4218  ;;  %v1409_v23 = vmul.f32 1.442695, %v1397_v20 }
 0x339   : > { %v1386_v24 = vpop.xlane.xlu0 %1385  ;;  %v1420_v25 = vsel %vm1000_vm3, %v4219_v21, 0.0 }
 0x33a   : > { %4224 = vpow2.f32 %v1409_v23  ;;  %v1398_v26 = vsub.f32 %v1272_v47, %v1386_v24  ;;  %1421 = vadd.xlane.f32.xlu0 %v1420_v25  ;;  %v990_v25 = vpack.c.bf16 %v4791_v36, %v4791_v36 }
 0x33c   : > { %v4852_v22 = vpop.eup %4220  ;;  %v1411_v27 = vmul.f32 1.442695, %v1398_v26 }
 0x33d   : > { %v1389_v28 = vpop.xlane.xlu1 %1388  ;;  %v1423_v29 = vsel %vm1000_vm3, %v4852_v22, 0.0 }
 0x33e   : > { %4226 = vpow2.f32 %v1411_v27  ;;  %v1399_v30 = vsub.f32 %v1318_v53, %v1389_v28  ;;  %1424 = vadd.xlane.f32.xlu1 %v1423_v29  ;;  %v1654_v28 = vsel %vm1468_vm4, %v990_v25, 0 }
 0x340   : > { %v4223_v31 = vpop.eup %4222  ;;  %v1413_v32 = vmul.f32 1.442695, %v1399_v30 }
 0x341   : > { %v968_v33 = vpop.permute.xlu1 %967  ;;  %v1392_v34 = vpop.xlane.xlu0 %1391  ;;  %v1426_v35 = vsel %vm1000_vm3, %v4223_v31, 0.0 }
 0x342   : > { %4228 = vpow2.f32 %v1413_v32  ;;  %v987_v37 = vpack.c.bf16 %v968_v33, %v968_v33  ;;  %v1400_v38 = vsub.f32 %v1364_v59, %v1392_v34  ;;  %1427 = vadd.xlane.f32.xlu0 %v1426_v35 }
 0x344   : > { %v4857_v39 = vpop.eup %4224  ;;  %v1516_v40 = vsel %vm1468_vm4, %v987_v37, 0  ;;  %v1415_v41 = vmul.f32 1.442695, %v1400_v38 }
 0x345   : > { %3887 = vmatpush3.bf16.msra.mxu0 %v1516_v40  ;;  %v1429_v42 = vsel %vm1000_vm3, %v4857_v39, 0.0 }
 0x346   : > { %4230 = vpow2.f32 %v1415_v41  ;;  %1430 = vadd.xlane.f32.xlu1 %v1429_v42  ;;  %3898 = vmatprep.subr.bf16.mxu0 %v4442_v3 }
 0x348   : > { %v4227_v43 = vpop.eup %4226 }
 0x349   : > { %v1432_v44 = vsel %vm1000_vm3, %v4227_v43, 0.0 }
 0x34a   : > { %1433 = vadd.xlane.f32.xlu0 %v1432_v44 }
 0x34c   : > { %v4864_v45 = vpop.eup %4228 }
 0x34d   : > { %v1435_v46 = vsel %vm1000_vm3, %v4864_v45, 0.0 }
 0x34e   : > { %1436 = vadd.xlane.f32.xlu0 %v1435_v46 }
 0x350   : > { %v4868_v47 = vpop.eup %4230 }
 0x351   : > { %v1438_v48 = vsel %vm1000_vm3, %v4868_v47, 0.0 }
 0x352   : > { %1439 = vadd.xlane.f32.xlu0 %v1438_v48 }
 0x357   : > { %973 = vrot.lane.b32.xlu1 %v4812_v60, %s4445_s26 }
 0x35b   : > { %977 = vrot.lane.b32.xlu1 %v4791_v36, %s4444_s4 }
 0x35f   : > { %980 = vrot.lane.b32.xlu1 %v4791_v36, %s4446_s30 }
 0x363   : > { %983 = vrot.lane.b32.xlu1 %v4791_v36, %s4445_s26 }
 0x368   : > { %970 = vrot.lane.b32.xlu0 %v4812_v60, %s4446_s30 }
 0x372   : > { %v1419_v49 = vpop.xlane.xlu1 %1418 }
 0x373   : > { %4232 = vrcp.f32 %v1419_v49 }
 0x37d   : > { %v4233_v50 = vpop.eup %4232 }
 0x37e   : > { %v1449_v51 = vmul.f32 %v4233_v50, %v4847_v5  ;;  %v4199_v50 = vld [vmem:[%s4673_s23 + $0x30] sm:$0xff]  }
 0x380   : > { %v1457_v52 = vpack.c.bf16 %v1449_v51, %v1449_v51 }
 0x382   : > { %3883 = vmatmul.mubr.msk.bf16.vlgmr.msra.gmra.mrb[20].mxu1 %vm1000_vm3, %v1457_v52 }
 0x383   : > { %3894 = vmatprep.mubr.msk.bf16.mxu1 %vm4443_vm1, %v4442_v3 }
 0x3c7   : > { %v1422_v53 = vpop.xlane.xlu0 %1421 }
 0x3c8   : > { %4234 = vrcp.f32 %v1422_v53 }
 0x3cb   : > { %v1425_v54 = vpop.xlane.xlu1 %1424 }
 0x3cf   : > { %v1428_v55 = vpop.xlane.xlu0 %1427 }
 0x3d0   : > { %4236 = vrcp.f32 %v1428_v55 }
 0x3d1   : > { %4238 = vrcp.f32 %v1425_v54 }
 0x3d2   : > { %v4235_v56 = vpop.eup %4234 }
 0x3d3   : > { %v1450_v57 = vmul.f32 %v4235_v56, %v4219_v21  ;;  %v1431_v58 = vpop.xlane.xlu1 %1430 }
 0x3d5   : > { %v1458_v60 = vpack.c.bf16 %v1450_v57, %v1450_v57 }
 0x3d7   : > { %v974_v59 = vpop.permute.xlu1 %973  ;;  %3889 = vmatmul.mubr.msk.bf16.vlgmr.msra.gmra.mrb[24].mxu0 %vm1000_vm3, %v1458_v60  ;;  %v1434_v61 = vpop.xlane.xlu0 %1433 }
 0x3d8   : > { %v989_v62 = vpack.c.bf16 %v974_v59, %v974_v59  ;;  %4240 = vrcp.f32 %v1434_v61  ;;  %3900 = vmatprep.mubr.msk.bf16.mxu0 %vm4443_vm1, %v4442_v3 }
 0x3d9   : > { %4242 = vrcp.f32 %v1431_v58 }
 0x3da   : > { %v4237_v63 = vpop.eup %4236  ;;  %v1608_v0 = vsel %vm1468_vm4, %v989_v62, 0 }
 0x3db   : > { %v1452_v1 = vmul.f32 %v4237_v63, %v4223_v31  ;;  %v978_v2 = vpop.permute.xlu1 %977  ;;  %3899 = vmatpush3.bf16.msra.mxu0 %v1608_v0  ;;  %v1437_v4 = vpop.xlane.xlu0 %1436 }
 0x3dc   : > { %v991_v5 = vpack.c.bf16 %v978_v2, %v978_v2  ;;  %3910 = vmatprep.subr.bf16.mxu0 %v4442_v3  ;;  %v4239_v13 = vpop.eup %4238  ;;  %v4200_v2 = vld [vmem:[%s4673_s23 + $0x38] sm:$0xff]  }
 0x3dd   : > { %v1460_v6 = vpack.c.bf16 %v1452_v1, %v1452_v1  ;;  %v1451_v19 = vmul.f32 %v4239_v13, %v4852_v22 }
 0x3de   : > { %v1700_v9 = vsel %vm1468_vm4, %v991_v5, 0 }
 0x3df   : > { %v981_v10 = vpop.permute.xlu1 %980  ;;  %3901 = vmatmul.mubr.msk.bf16.vlgmr.msra.gmra.mrb[28].mxu0 %vm1000_vm3, %v1460_v6  ;;  %v1440_v12 = vpop.xlane.xlu0 %1439  ;;  %v1459_v26 = vpack.c.bf16 %v1451_v19, %v1451_v19 }
 0x3e0   : > { %3911 = vmatpush3.bf16.msra.mxu0 %v1700_v9  ;;  %4244 = vrcp.f32 %v1440_v12  ;;  %3912 = vmatprep.mubr.msk.bf16.mxu0 %vm4443_vm1, %v4442_v3  ;;  %v992_v31 = vpack.c.bf16 %v981_v10, %v981_v10 }
 0x3e1   : > { %3922 = vmatprep.subr.bf16.mxu0 %v4442_v3  ;;  %4246 = vrcp.f32 %v1437_v4 }
 0x3e2   : > { %v4241_v14 = vpop.eup %4240  ;;  %v1746_v34 = vsel %vm1468_vm4, %v992_v31, 0 }
 0x3e3   : > { %v1454_v15 = vmul.f32 %v4241_v14, %v4227_v43  ;;  %v984_v17 = vpop.permute.xlu1 %983  ;;  %v971_v18 = vpop.permute.xlu0 %970 }
 0x3e4   : > { %v993_v16 = vpack.c.bf16 %v984_v17, %v984_v17  ;;  %v988_v20 = vpack.c.bf16 %v971_v18, %v971_v18  ;;  %v4243_v27 = vpop.eup %4242 }
 0x3e5   : > { %v1462_v21 = vpack.c.bf16 %v1454_v15, %v1454_v15  ;;  %v1453_v29 = vmul.f32 %v4243_v27, %v4857_v39 }
 0x3e6   : > { %v1792_v23 = vsel %vm1468_vm4, %v993_v16, 0  ;;  %v1562_v24 = vsel %vm1468_vm4, %v988_v20, 0 }
 0x3e7   : > { %3893 = vmatpush3.bf16.msra.mxu1 %v1562_v24  ;;  %3913 = vmatmul.mubr.msk.bf16.vlgmr.msra.gmra.mrb[32].mxu0 %vm1000_vm3, %v1462_v21  ;;  %v1461_v32 = vpack.c.bf16 %v1453_v29, %v1453_v29 }
 0x3e8   : > { %3923 = vmatpush3.bf16.msra.mxu0 %v1792_v23  ;;  %3904 = vmatprep.subr.bf16.mxu1 %v4442_v3 }
 0x3e9   : > { %3924 = vmatprep.mubr.msk.bf16.mxu0 %vm4443_vm1, %v4442_v3  ;;  %3936 = vmatprep.subr.bf16.mxu0 %v4442_v3 }
 0x3ea   : > { %v4245_v22 = vpop.eup %4244  ;;  %3895 = vmatmul.mubr.msk.bf16.vlgmr.msra.gmra.mrb[24].mxu1 %vm1000_vm3, %v1459_v26 }
 0x3eb   : > { %v1456_v36 = vmul.f32 %v4245_v22, %v4868_v47  ;;  %3905 = vmatpush3.bf16.msra.mxu1 %v1654_v28  ;;  %3906 = vmatprep.mubr.msk.bf16.mxu1 %vm4443_vm1, %v4442_v3  ;;  %v4247_v33 = vpop.eup %4246 }
 0x3ec   : > { %3916 = vmatprep.subr.bf16.mxu1 %v4442_v3  ;;  %v1455_v35 = vmul.f32 %v4247_v33, %v4864_v45 }
 0x3ed   : > { %v1464_v30 = vpack.c.bf16 %v1456_v36, %v1456_v36 }
 0x3ee   : > { %v1463_v37 = vpack.c.bf16 %v1455_v35, %v1455_v35 }
 0x3ef   : > { %3925 = vmatmul.mubr.msk.bf16.vlgmr.msra.gmra.mrb[36].mxu0 %vm1000_vm3, %v1464_v30  ;;  %v3656_v30 = vld [vmem:[%s4694_s15 + $0x3] ss:$0 sm:$0xff] }
 0x3f0   : > { %3940 = vmatprep.mubr.msk.bf16.mxu0 %vm4443_vm1, %v4442_v3 }
 0x3f2   : > { %3907 = vmatmul.mubr.msk.bf16.vlgmr.msra.gmra.mrb[28].mxu1 %vm1000_vm3, %v1461_v32 }
 0x3f3   : > { %3917 = vmatpush3.bf16.msra.mxu1 %v1746_v34  ;;  %3918 = vmatprep.mubr.msk.bf16.mxu1 %vm4443_vm1, %v4442_v3 }
 0x3f4   : > { %3928 = vmatprep.subr.bf16.mxu1 %v4442_v3 }
 0x3fa   : > { %3919 = vmatmul.mubr.msk.bf16.vlgmr.msra.gmra.mrb[32].mxu1 %vm1000_vm3, %v1463_v37 }
 0x3fb   : > { %3932 = vmatprep.mubr.msk.bf16.mxu1 %vm4443_vm1, %v4442_v3  ;;  %3929 = vmatpush3.bf16.msra.mxu1 %v4199_v50  ;;  %v4201_v50 = vld [vmem:[%s4679_s16 + $0x10] sm:$0xff]  }
 0x3fc   : > { %3930 = vmatprep.subr.bf16.mxu1 %v4442_v3 }
 0x3ff   : > { %3931 = vmatpush3.bf16.msra.mxu1 %v4200_v2 }
 0x400   : > { %3944 = vmatprep.subr.bf16.mxu1 %v4442_v3 }
 0x455   : > { %v1506_v38 = vpop.f32.mrb[20].mxu1 }
 0x456   : > { %v3884_v39 = vpop.f32.mrb[21].mxu1 }
 0x457   : > { %v1509_v40 = vpop.f32.mrb[22].mxu1 }
 0x458   : > { %v3885_v41 = vpop.f32.mrb[23].mxu1 }
 0x4aa   : > { %v1552_v42 = vpop.f32.mrb[24].mxu0 }
 0x4ab   : > { %v3890_v43 = vpop.f32.mrb[25].mxu0 }
 0x4ac   : > { %v1555_v44 = vpop.f32.mrb[26].mxu0 }
 0x4ad   : > { %v3891_v46 = vpop.f32.mrb[27].mxu0 }
 0x4b2   : > { %v1644_v47 = vpop.f32.mrb[28].mxu0 }
 0x4b3   : > { %v3902_v48 = vpop.f32.mrb[29].mxu0 }
 0x4b4   : > { %v1647_v45 = vpop.f32.mrb[30].mxu0 }
 0x4b5   : > { %v3903_v49 = vpop.f32.mrb[31].mxu0 }
 0x4ba   : > { %v1736_v51 = vpop.f32.mrb[32].mxu0 }
 0x4bb   : > { %v4163_v52 = vpack.i.bf16 %v1736_v51, %v1552_v42  ;;  %v3914_v53 = vpop.f32.mrb[33].mxu0  ;;  %v4202_v51 = vld [vmem:[%s4679_s16 + $0x18] sm:$0xff]  }
 0x4bc   : > { %v1739_v54 = vpop.f32.mrb[34].mxu0  ;;  %v4204_v53 = vld [vmem:[%s4679_s16] sm:$0xff]  }
 0x4bd   : > { %v1598_v55 = vpop.f32.mrb[24].mxu1  ;;  %4164 = vrot.lane.b32.xlu0 %v4163_v52, %s4448_s28  ;;  %v3915_v56 = vpop.f32.mrb[35].mxu0  ;;  %v4203_v52 = vld [vmem:[%s5266_s1] sm:$0xff]   ;;  %3937 = vmatpush3.bf16.msra.mxu0 %v4204_v53  ;;  %v4205_v54 = vld [vmem:[%s4679_s16 + $0x8] sm:$0xff]  }
 0x4be   : > { %v3896_v57 = vpop.f32.mrb[25].mxu1  ;;  %3938 = vmatprep.subr.bf16.mxu0 %v4442_v3 }
 0x4bf   : > { %v1601_v58 = vpop.f32.mrb[26].mxu1 }
 0x4c0   : > { %v3897_v60 = vpop.f32.mrb[27].mxu1 }
 0x4c1   : > { %3939 = vmatpush3.bf16.msra.mxu0 %v4205_v54 }
 0x4c2   : > { %v1828_v59 = vpop.f32.mrb[36].mxu0  ;;  %3952 = vmatprep.subr.bf16.mxu0 %v4442_v3 }
 0x4c3   : > { %v4173_v61 = vpack.i.bf16 %v1828_v59, %v1644_v47  ;;  %v3926_v62 = vpop.f32.mrb[37].mxu0 }
 0x4c4   : > { %v1831_v63 = vpop.f32.mrb[38].mxu0  ;;  %v688_v62 = vld [vmem:[%s4699_s18] sm:$0x3] }
 0x4c5   : > { %v1690_v0 = vpop.f32.mrb[28].mxu1  ;;  %4174 = vrot.lane.b32.xlu0 %v4173_v61, %s4449_s13  ;;  %v3927_v1 = vpop.f32.mrb[39].mxu0  ;;  %v1960_v61 = vsub.s32 0, %v4834_v11 }
 0x4c6   : > { %v3908_v4 = vpop.f32.mrb[29].mxu1 }
 0x4c7   : > { %v1693_v5 = vpop.f32.mrb[30].mxu1  ;;  %v1961_v63 = vrot.slane %v688_v62, %v1960_v61 }
 0x4c8   : > { %v3909_v6 = vpop.f32.mrb[31].mxu1 }
 0x4cd   : > { %v1782_v9 = vpop.f32.mrb[32].mxu1 }
 0x4ce   : > { %v4168_v10 = vpack.i.bf16 %v1782_v9, %v1598_v55  ;;  %v3920_v12 = vpop.f32.mrb[33].mxu1 }
 0x4cf   : > { %v1785_v13 = vpop.f32.mrb[34].mxu1 }
 0x4d0   : > { %4169 = vrot.lane.b32.xlu1 %v4168_v10, %s4450_s29  ;;  %v3921_v14 = vpop.f32.mrb[35].mxu1 }
 0x52f   : > { %v4165_v15 = vpop.permute.xlu0 %4164 }
 0x530   : > { %v4167_v17 = vunpack.i.h.bf16 %v4165_v15  ;;  %v4166_v18 = vunpack.i.l.bf16 %v4165_v15  ;;  %v3664_v15 = vld [vmem:[%s4704_s20 + $0x1] ss:$0 sm:$0xff] }
 0x532   : > { %v1863_v23 = vsel %vm1000_vm3, %v1690_v0, %v4167_v17  ;;  %v1846_v24 = vsel %vm1000_vm3, %v1506_v38, %v4166_v18  ;;  %v1966_v0 = vsub.s32 1, %v4834_v11  ;;  %v4215_v11 = vld [vmem:[%s4725_s12 + $0x18] sm:$0xff]  }
 0x534   : > { %v1967_v9 = vrot.slane %v688_v62, %v1966_v0 }
 0x537   : > { %v4175_v19 = vpop.permute.xlu0 %4174 }
 0x538   : > { %v4177_v25 = vunpack.i.h.bf16 %v4175_v19  ;;  %v4176_v26 = vunpack.i.l.bf16 %v4175_v19 }
 0x542   : > { %v4170_v16 = vpop.permute.xlu1 %4169 }
 0x543   : > { %v4172_v20 = vunpack.i.h.bf16 %v4170_v16  ;;  %v4171_v21 = vunpack.i.l.bf16 %v4170_v16 }
 0x545   : > { %v1848_v27 = vsel %vm1847_vm6, %v1846_v24, %v4171_v21  ;;  %v1864_v22 = vsel %vm1847_vm6, %v1863_v23, %v4172_v20 }
 0x546   : > { %v1850_v28 = vsel %vm1849_vm7, %v1848_v27, %v4176_v26  ;;  %v1865_v36 = vsel %vm1849_vm7, %v1864_v22, %v4177_v25  ;;  %v4206_v25 = vld [vmem:[%s4679_s16 + $0x20] sm:$0xff]   ;;  %v4207_v26 = vld [vmem:[%s4679_s16 + $0x28] sm:$0xff]  }
 0x547   : > { %v1866_v29 = vpack.c.bf16 %v1865_v36, %v1850_v28 }
 0x549   : > { %3933 = vmatmul.mubr.msk.bf16.vlgmr.msra.gmra.mrb[36].mxu1 %vm747_vm2, %v1866_v29  ;;  %v3660_v29 = vld [vmem:[%s4704_s20] ss:$0 sm:$0xff] }
 0x54a   : > { %3948 = vmatprep.mubr.msk.bf16.mxu1 %vm4443_vm1, %v4442_v3  ;;  %3945 = vmatpush3.bf16.msra.mxu1 %v4201_v50 }
 0x54b   : > { %3946 = vmatprep.subr.bf16.mxu1 %v4442_v3 }
 0x54e   : > { %3947 = vmatpush3.bf16.msra.mxu1 %v4202_v51 }
 0x54f   : > { %3960 = vmatprep.subr.bf16.mxu1 %v4442_v3 }
 0x551   : > { %3949 = vmatmul.mubr.msk.bf16.vlgmr.msra.gmra.mrb[40].mxu1 %vm747_vm2, %v4203_v52 }
 0x552   : > { %3962 = vmatprep.mubr.msk.bf16.mxu1 %vm4443_vm1, %v4442_v3 }
 0x61c   : > { %v1922_v31 = vpop.f32.mrb[36].mxu1 }
 0x61d   : > { %v1923_v32 = vadd.f32 %v3656_v30, %v1922_v31  ;;  %v3934_v33 = vpop.f32.mrb[37].mxu1 }
 0x61e   : > { %v1925_v34 = vpop.f32.mrb[38].mxu1 }
 0x61f   : > { %v1926_v35 = vadd.f32 %v3656_v30, %v1925_v34  ;;  %v3935_v37 = vpop.f32.mrb[39].mxu1  ;;  %v1929_v38 = vadd.f32 %v1923_v32, %v4750_v7 }
 0x621   : > { %v1931_v39 = vsel %vm747_vm2, %v1929_v38, 0.0  ;;  %v1930_v40 = vadd.f32 %v1926_v35, %v4752_v8 }
 0x622   : > { %1932 = vadd.xlane.f32.xlu1 %v1931_v39 }
 0x623   : > { %v1934_v41 = vsel %vm747_vm2, %v1930_v40, 0.0 }
 0x624   : > { %1935 = vadd.xlane.f32.xlu0 %v1934_v41  ;;  %v2093_v17 = vpop.f32.mrb[40].mxu1 }
 0x625   : > { %v2094_v18 = vadd.f32 %v3664_v15, %v2093_v17  ;;  %v3950_v19 = vpop.f32.mrb[41].mxu1 }
 0x626   : > { %v2096_v16 = vpop.f32.mrb[42].mxu1 }
 0x627   : > { %v4980_v20 = vadd.f32 %v3664_v15, %v2096_v16  ;;  %v3951_v21 = vpop.f32.mrb[43].mxu1  ;;  %v2207_v23 = vpack.c.bf16 %v2094_v18, %v2094_v18 }
 0x629   : > { %v2247_v24 = vsel %vm1000_vm3, %v2207_v23, 0  ;;  %v2211_v50 = vpack.c.bf16 %v4980_v20, %v4980_v20 }
 0x62a   : > { %3961 = vmatpush3.bf16.xpose.msra.mxu1 %v2247_v24 }
 0x62b   : > { %3972 = vmatprep.subr.bf16.mxu1 %v4442_v3  ;;  %v2431_v54 = vsel %vm1000_vm3, %v2211_v50, 0 }
 0x6af   : > { %v1933_v42 = vpop.xlane.xlu1 %1932 }
 0x6b0   : > { %v1938_v43 = vmul.f32 0.03125, %v1933_v42 }
 0x6b1   : > { %v1936_v44 = vpop.xlane.xlu0 %1935 }
 0x6b2   : > { %v1940_v46 = vsub.f32 %v1929_v38, %v1938_v43  ;;  %v1939_v47 = vmul.f32 0.03125, %v1936_v44 }
 0x6b4   : > { %v1941_v48 = vsub.f32 %v1930_v40, %v1939_v47  ;;  %v1942_v45 = vmul.f32 %v1940_v46, %v1940_v46  ;;  %v3669_v40 = vld [vmem:[%s4704_s20 + $0x2] ss:$0 sm:$0xff] }
 0x6b6   : > { %v1944_v7 = vsel %vm747_vm2, %v1942_v45, 0.0  ;;  %v1943_v49 = vmul.f32 %v1941_v48, %v1941_v48 }
 0x6b7   : > { %1945 = vadd.xlane.f32.xlu0 %v1944_v7 }
 0x6b8   : > { %v1947_v8 = vsel %vm747_vm2, %v1943_v49, 0.0 }
 0x6b9   : > { %1948 = vadd.xlane.f32.xlu1 %v1947_v8 }
 0x6ca   : > { %2191 = vrot.lane.b32.xlu1 %v2094_v18, %s4446_s30 }
 0x6cd   : > { %2188 = vrot.lane.b32.xlu0 %v2094_v18, %s4444_s4 }
 0x6d1   : > { %2194 = vrot.lane.b32.xlu0 %v2094_v18, %s4445_s26 }
 0x744   : > { %v1946_v55 = vpop.xlane.xlu0 %1945 }
 0x745   : > { %v1950_v56 = vmul.f32 0.03125, %v1946_v55 }
 0x746   : > { %v1949_v57 = vpop.xlane.xlu1 %1948 }
 0x747   : > { %v1952_v58 = vadd.f32 1e-05, %v1950_v56  ;;  %v1951_v60 = vmul.f32 0.03125, %v1949_v57 }
 0x748   : > { %v2189_v27 = vpop.permute.xlu0 %2188 }
 0x749   : > { %4248 = vrsqrt.f32 %v1952_v58  ;;  %v1953_v59 = vadd.f32 1e-05, %v1951_v60  ;;  %v2208_v22 = vpack.c.bf16 %v2189_v27, %v2189_v27 }
 0x74a   : > { %v2192_v36 = vpop.permute.xlu1 %2191 }
 0x74b   : > { %4250 = vrsqrt.f32 %v1953_v59  ;;  %v2293_v28 = vsel %vm1000_vm3, %v2208_v22, 0  ;;  %v2209_v30 = vpack.c.bf16 %v2192_v36, %v2192_v36 }
 0x74c   : > { %v2195_v43 = vpop.permute.xlu0 %2194 }
 0x74d   : > { %v2339_v38 = vsel %vm1000_vm3, %v2209_v30, 0 }
 0x753   : > { %v4249_v1 = vpop.eup %4248 }
 0x754   : > { %v1956_v2 = vmul.f32 %v4249_v1, %v1940_v46 }
 0x755   : > { %v4251_v4 = vpop.eup %4250 }
 0x756   : > { %v1962_v5 = vmul.f32 %v1961_v63, %v1956_v2  ;;  %v1957_v6 = vmul.f32 %v4251_v4, %v1941_v48  ;;  %v2210_v48 = vpack.c.bf16 %v2195_v43, %v2195_v43 }
 0x758   : > { %v1963_v10 = vmul.f32 %v1961_v63, %v1957_v6  ;;  %v4969_v12 = vadd.f32 %v1967_v9, %v1962_v5  ;;  %v2385_v8 = vsel %vm1000_vm3, %v2210_v48, 0 }
 0x75a   : > { %v4971_v13 = vadd.f32 %v1967_v9, %v1963_v10 }
 0x75c   : > { %v1970_v14 = vpack.c.bf16 %v4971_v13, %v4969_v12 }
 0x75e   : > { %3941 = vmatmul.mubr.msk.bf16.vlgmr.msra.gmra.mrb[40].mxu0 %vm747_vm2, %v1970_v14 }
 0x75f   : > { %3956 = vmatprep.mubr.msk.bf16.mxu0 %vm4443_vm1, %v4442_v3  ;;  %3953 = vmatpush3.bf16.msra.mxu0 %v4206_v25 }
 0x760   : > { %3954 = vmatprep.subr.bf16.mxu0 %v4442_v3 }
 0x763   : > { %3955 = vmatpush3.bf16.msra.mxu0 %v4207_v26 }
 0x764   : > { %3966 = vmatprep.subr.bf16.mxu0 %v4442_v3 }
 0x766   : > { %3957 = vmatmul.mubr.msk.bf16.vlgmr.msra.gmra.mrb[44].mxu0 %vm747_vm2, %v4203_v52 }
 0x767   : > { %3968 = vmatprep.mubr.msk.bf16.mxu0 %vm4443_vm1, %v4442_v3 }
 0x76c   : > { %3967 = vmatpush3.bf16.xpose.msra.mxu0 %v2293_v28 }
 0x76d   : > { %3978 = vmatprep.subr.bf16.mxu0 %v4442_v3 }
 0x831   : > { %v2026_v31 = vpop.f32.mrb[40].mxu0 }
 0x832   : > { %v2027_v32 = vadd.f32 %v3660_v29, %v2026_v31  ;;  %v3942_v33 = vpop.f32.mrb[41].mxu0 }
 0x833   : > { %v2029_v34 = vpop.f32.mrb[42].mxu0 }
 0x834   : > { %v2179_v35 = vpack.c.bf16 %v2027_v32, %v2027_v32  ;;  %2166 = vrot.lane.b32.xlu0 %v2027_v32, %s4445_s26  ;;  %2160 = vrot.lane.b32.xlu1 %v2027_v32, %s4444_s4  ;;  %v3943_v37 = vpop.f32.mrb[43].mxu0  ;;  %v2030_v39 = vadd.f32 %v3660_v29, %v2029_v34 }
 0x836   : > { %3963 = vmatmul.mubr.msk.bf16.vlgmr.msra.gmra.mrb[44].mxu1 %vm1000_vm3, %v2179_v35  ;;  %v2183_v63 = vpack.c.bf16 %v2030_v39, %v2030_v39 }
 0x837   : > { %3973 = vmatpush3.bf16.xpose.msra.mxu1 %v2339_v38  ;;  %3974 = vmatprep.mubr.msk.bf16.mxu1 %vm4443_vm1, %v4442_v3 }
 0x838   : > { %2201 = vrot.lane.b32.xlu0 %v4980_v20, %s4446_s30  ;;  %2163 = vrot.lane.b32.xlu1 %v2027_v32, %s4446_s30 }
 0x839   : > { %3984 = vmatprep.subr.bf16.mxu1 %v4442_v3  ;;  %v2152_v41 = vpop.f32.mrb[44].mxu0 }
 0x83a   : > { %v3958_v42 = vpop.f32.mrb[45].mxu0  ;;  %v2153_v15 = vadd.f32 %v3669_v40, %v2152_v41 }
 0x83b   : > { %v2155_v44 = vpop.f32.mrb[46].mxu0 }
 0x83c   : > { %2204 = vrot.lane.b32.xlu0 %v4980_v20, %s4445_s26  ;;  %2198 = vrot.lane.b32.xlu1 %v4980_v20, %s4444_s4  ;;  %v5014_v46 = vadd.f32 %v3669_v40, %v2155_v44  ;;  %v3959_v47 = vpop.f32.mrb[47].mxu0  ;;  %v2235_v17 = vpack.c.bf16 %v2153_v15, %v2153_v15 }
 0x83e   : > { %v2711_v18 = vsel %vm1468_vm4, %v2235_v17, 0 }
 0x840   : > { %2176 = vrot.lane.b32.xlu0 %v2030_v39, %s4445_s26  ;;  %2170 = vrot.lane.b32.xlu1 %v2030_v39, %s4444_s4 }
 0x844   : > { %2173 = vrot.lane.b32.xlu1 %v2030_v39, %s4446_s30 }
 0x8a6   : > { %v2167_v45 = vpop.permute.xlu0 %2166  ;;  %v2161_v7 = vpop.permute.xlu1 %2160 }
 0x8a7   : > { %v2180_v49 = vpack.c.bf16 %v2161_v7, %v2161_v7  ;;  %v2182_v56 = vpack.c.bf16 %v2167_v45, %v2167_v45 }
 0x8a9   : > { %3969 = vmatmul.mubr.msk.bf16.vlgmr.msra.gmra.mrb[48].mxu0 %vm1000_vm3, %v2180_v49 }
 0x8aa   : > { %3979 = vmatpush3.bf16.xpose.msra.mxu0 %v2385_v8  ;;  %v2164_v51 = vpop.permute.xlu1 %2163  ;;  %3980 = vmatprep.mubr.msk.bf16.mxu0 %vm4443_vm1, %v4442_v3  ;;  %v2202_v53 = vpop.permute.xlu0 %2201 }
 0x8ab   : > { %v2181_v52 = vpack.c.bf16 %v2164_v51, %v2164_v51  ;;  %3990 = vmatprep.subr.bf16.mxu0 %v4442_v3  ;;  %v2213_v58 = vpack.c.bf16 %v2202_v53, %v2202_v53 }
 0x8ad   : > { %3975 = vmatmul.mubr.msk.bf16.vlgmr.msra.gmra.mrb[48].mxu1 %vm1000_vm3, %v2181_v52  ;;  %v2523_v1 = vsel %vm1000_vm3, %v2213_v58, 0 }
 0x8ae   : > { %3985 = vmatpush3.bf16.xpose.msra.mxu1 %v2431_v54  ;;  %v2199_v55 = vpop.permute.xlu1 %2198  ;;  %3986 = vmatprep.mubr.msk.bf16.mxu1 %vm4443_vm1, %v4442_v3  ;;  %v2205_v59 = vpop.permute.xlu0 %2204 }
 0x8af   : > { %v2212_v57 = vpack.c.bf16 %v2199_v55, %v2199_v55  ;;  %3996 = vmatprep.subr.bf16.mxu1 %v4442_v3  ;;  %v2214_v2 = vpack.c.bf16 %v2205_v59, %v2205_v59 }
 0x8b1   : > { %v2477_v60 = vsel %vm1000_vm3, %v2212_v57, 0  ;;  %3981 = vmatmul.mubr.msk.bf16.vlgmr.msra.gmra.mrb[52].mxu0 %vm1000_vm3, %v2182_v56  ;;  %v2569_v6 = vsel %vm1000_vm3, %v2214_v2, 0 }
 0x8b2   : > { %3991 = vmatpush3.bf16.xpose.msra.mxu0 %v2477_v60  ;;  %v2171_v62 = vpop.permute.xlu1 %2170  ;;  %3992 = vmatprep.mubr.msk.bf16.mxu0 %vm4443_vm1, %v4442_v3  ;;  %v2177_v10 = vpop.permute.xlu0 %2176 }
 0x8b3   : > { %4002 = vmatprep.subr.bf16.mxu0 %v4442_v3  ;;  %v2184_v4 = vpack.c.bf16 %v2171_v62, %v2171_v62  ;;  %v2186_v14 = vpack.c.bf16 %v2177_v10, %v2177_v10 }
 0x8b5   : > { %3987 = vmatmul.mubr.msk.bf16.vlgmr.msra.gmra.mrb[52].mxu1 %vm1000_vm3, %v2183_v63 }
 0x8b6   : > { %3997 = vmatpush3.bf16.xpose.msra.mxu1 %v2523_v1  ;;  %3998 = vmatprep.mubr.msk.bf16.mxu1 %vm4443_vm1, %v4442_v3  ;;  %v2174_v5 = vpop.permute.xlu1 %2173 }
 0x8b7   : > { %4008 = vmatprep.subr.bf16.mxu1 %v4442_v3  ;;  %v2185_v9 = vpack.c.bf16 %v2174_v5, %v2174_v5 }
 0x8b9   : > { %3993 = vmatmul.mubr.msk.bf16.vlgmr.msra.gmra.mrb[56].mxu0 %vm1000_vm3, %v2184_v4 }
 0x8ba   : > { %4003 = vmatpush3.bf16.xpose.msra.mxu0 %v2569_v6  ;;  %4004 = vmatprep.mubr.msk.bf16.mxu0 %vm4443_vm1, %v4442_v3 }
 0x8bb   : > { %4014 = vmatprep.subr.bf16.mxu0 %v4442_v3 }
 0x8bd   : > { %3999 = vmatmul.mubr.msk.bf16.vlgmr.msra.gmra.mrb[56].mxu1 %vm1000_vm3, %v2185_v9 }
 0x8be   : > { %4010 = vmatprep.mubr.msk.bf16.mxu1 %vm4443_vm1, %v4442_v3  ;;  %4009 = vmatpush3.bf16.msra.mxu1 %v2711_v18 }
 0x8bf   : > { %4020 = vmatprep.subr.bf16.mxu1 %v4442_v3 }
 0x8c1   : > { %4005 = vmatmul.mubr.msk.bf16.vlgmr.msra.gmra.mrb[60].mxu0 %vm1000_vm3, %v2186_v14 }
 0x8c2   : > { %4016 = vmatprep.mubr.msk.bf16.mxu0 %vm4443_vm1, %v4442_v3 }
 0x909   : > { %v2283_v19 = vpop.f32.mrb[44].mxu1 }
 0x90a   : > { %v3964_v16 = vpop.f32.mrb[45].mxu1  ;;  %v2611_v20 = vsel %vm1000_vm3, %v2283_v19, -inf }
 0x90b   : > { %v2286_v21 = vpop.f32.mrb[46].mxu1  ;;  %2612 = vmax.xlane.f32.xlu1 %v2611_v20 }
 0x90c   : > { %v3965_v23 = vpop.f32.mrb[47].mxu1 }
 0x97c   : > { %v2329_v24 = vpop.f32.mrb[48].mxu0 }
 0x97d   : > { %v3970_v25 = vpop.f32.mrb[49].mxu0  ;;  %v2614_v26 = vsel %vm1000_vm3, %v2329_v24, -inf }
 0x97e   : > { %2615 = vmax.xlane.f32.xlu0 %v2614_v26  ;;  %v2332_v27 = vpop.f32.mrb[50].mxu0 }
 0x97f   : > { %v3971_v22 = vpop.f32.mrb[51].mxu0 }
 0x980   : > { %v2375_v28 = vpop.f32.mrb[48].mxu1 }
 0x981   : > { %v3976_v36 = vpop.f32.mrb[49].mxu1  ;;  %v2617_v29 = vsel %vm1000_vm3, %v2375_v28, -inf }
 0x982   : > { %v2378_v30 = vpop.f32.mrb[50].mxu1  ;;  %2618 = vmax.xlane.f32.xlu0 %v2617_v29 }
 0x983   : > { %v3977_v31 = vpop.f32.mrb[51].mxu1 }
 0x984   : > { %v2421_v32 = vpop.f32.mrb[52].mxu0 }
 0x985   : > { %v3982_v33 = vpop.f32.mrb[53].mxu0  ;;  %v2620_v34 = vsel %vm1000_vm3, %v2421_v32, -inf }
 0x986   : > { %2621 = vmax.xlane.f32.xlu1 %v2620_v34  ;;  %v2424_v35 = vpop.f32.mrb[54].mxu0 }
 0x987   : > { %v3983_v37 = vpop.f32.mrb[55].mxu0 }
 0x988   : > { %v2467_v38 = vpop.f32.mrb[52].mxu1 }
 0x989   : > { %v3988_v39 = vpop.f32.mrb[53].mxu1  ;;  %v2623_v40 = vsel %vm1000_vm3, %v2467_v38, -inf }
 0x98a   : > { %v2470_v41 = vpop.f32.mrb[54].mxu1  ;;  %2624 = vmax.xlane.f32.xlu0 %v2623_v40 }
 0x98b   : > { %v3989_v42 = vpop.f32.mrb[55].mxu1 }
 0x98c   : > { %v2513_v43 = vpop.f32.mrb[56].mxu0 }
 0x98d   : > { %v3994_v44 = vpop.f32.mrb[57].mxu0  ;;  %v2626_v47 = vsel %vm1000_vm3, %v2513_v43, -inf }
 0x98e   : > { %2627 = vmax.xlane.f32.xlu1 %v2626_v47  ;;  %v2516_v48 = vpop.f32.mrb[58].mxu0 }
 0x98f   : > { %v3995_v45 = vpop.f32.mrb[59].mxu0 }
 0x990   : > { %v2559_v7 = vpop.f32.mrb[56].mxu1 }
 0x991   : > { %v4000_v49 = vpop.f32.mrb[57].mxu1  ;;  %v2629_v8 = vsel %vm1000_vm3, %v2559_v7, -inf }
 0x992   : > { %v2562_v50 = vpop.f32.mrb[58].mxu1  ;;  %2630 = vmax.xlane.f32.xlu0 %v2629_v8 }
 0x993   : > { %v4001_v51 = vpop.f32.mrb[59].mxu1 }
 0x994   : > { %v2605_v52 = vpop.f32.mrb[60].mxu0 }
 0x995   : > { %v4006_v53 = vpop.f32.mrb[61].mxu0  ;;  %v2632_v54 = vsel %vm1000_vm3, %v2605_v52, -inf }
 0x996   : > { %2633 = vmax.xlane.f32.xlu1 %v2632_v54  ;;  %v2608_v55 = vpop.f32.mrb[62].mxu0 }
 0x997   : > { %v4007_v56 = vpop.f32.mrb[63].mxu0 }
 0x998   : > { %v2613_v57 = vpop.xlane.xlu1 %2612 }
 0x999   : > { %v2635_v58 = vsub.f32 %v2283_v19, %v2613_v57 }
 0x99b   : > { %v2643_v60 = vmul.f32 1.442695, %v2635_v58 }
 0x99d   : > { %4252 = vpow2.f32 %v2643_v60 }
 0x9a7   : > { %2219 = vrot.lane.b32.xlu1 %v2153_v15, %s4446_s30  ;;  %v5061_v59 = vpop.eup %4252 }
 0x9a8   : > { %2216 = vrot.lane.b32.xlu0 %v2153_v15, %s4444_s4  ;;  %v2659_v62 = vsel %vm1000_vm3, %v5061_v59, 0.0 }
 0x9c7   : > { %2660 = vadd.xlane.f32.xlu0 %v2659_v62 }
 0x9dd   : > { %2222 = vrot.lane.b32.xlu0 %v2153_v15, %s4445_s26 }
 0xa0b   : > { %v2616_v63 = vpop.xlane.xlu0 %2615 }
 0xa0c   : > { %v2636_v1 = vsub.f32 %v2329_v24, %v2616_v63 }
 0xa0e   : > { %v2645_v2 = vmul.f32 1.442695, %v2636_v1  ;;  %v2239_v1 = vpack.c.bf16 %v5014_v46, %v5014_v46 }
 0xa0f   : > { %v2619_v4 = vpop.xlane.xlu0 %2618 }
 0xa10   : > { %4254 = vpow2.f32 %v2645_v2  ;;  %v2637_v5 = vsub.f32 %v2375_v28, %v2619_v4 }
 0xa12   : > { %v2647_v6 = vmul.f32 1.442695, %v2637_v5 }
 0xa13   : > { %v2622_v9 = vpop.xlane.xlu1 %2621 }
 0xa14   : > { %4256 = vpow2.f32 %v2647_v6  ;;  %v2638_v10 = vsub.f32 %v2421_v32, %v2622_v9 }
 0xa16   : > { %v2649_v14 = vmul.f32 1.442695, %v2638_v10  ;;  %v2895_v10 = vsel %vm1468_vm4, %v2239_v1, 0 }
 0xa17   : > { %v2625_v17 = vpop.xlane.xlu0 %2624 }
 0xa18   : > { %4258 = vpow2.f32 %v2649_v14  ;;  %v2639_v18 = vsub.f32 %v2467_v38, %v2625_v17 }
 0xa1a   : > { %v5066_v19 = vpop.eup %4254  ;;  %v2651_v16 = vmul.f32 1.442695, %v2639_v18 }
 0xa1b   : > { %v2628_v20 = vpop.xlane.xlu1 %2627  ;;  %v2662_v15 = vsel %vm1000_vm3, %v5066_v19, 0.0 }
 0xa1c   : > { %4260 = vpow2.f32 %v2651_v16  ;;  %v2640_v21 = vsub.f32 %v2513_v43, %v2628_v20  ;;  %2663 = vadd.xlane.f32.xlu1 %v2662_v15 }
 0xa1e   : > { %v5070_v23 = vpop.eup %4256  ;;  %v2653_v24 = vmul.f32 1.442695, %v2640_v21 }
 0xa1f   : > { %v2631_v25 = vpop.xlane.xlu0 %2630  ;;  %v2665_v26 = vsel %vm1000_vm3, %v5070_v23, 0.0 }
 0xa20   : > { %4262 = vpow2.f32 %v2653_v24  ;;  %v2641_v27 = vsub.f32 %v2559_v7, %v2631_v25  ;;  %2666 = vadd.xlane.f32.xlu0 %v2665_v26 }
 0xa22   : > { %v5074_v22 = vpop.eup %4258  ;;  %v2655_v28 = vmul.f32 1.442695, %v2641_v27 }
 0xa23   : > { %v2217_v36 = vpop.permute.xlu0 %2216  ;;  %v2634_v29 = vpop.xlane.xlu1 %2633  ;;  %v2668_v30 = vsel %vm1000_vm3, %v5074_v22, 0.0 }
 0xa24   : > { %4264 = vpow2.f32 %v2655_v28  ;;  %v2236_v31 = vpack.c.bf16 %v2217_v36, %v2217_v36  ;;  %v2642_v32 = vsub.f32 %v2605_v52, %v2634_v29  ;;  %2669 = vadd.xlane.f32.xlu1 %v2668_v30 }
 0xa26   : > { %v5078_v33 = vpop.eup %4260  ;;  %v2757_v34 = vsel %vm1468_vm4, %v2236_v31, 0  ;;  %v2657_v35 = vmul.f32 1.442695, %v2642_v32 }
 0xa27   : > { %4015 = vmatpush3.bf16.msra.mxu0 %v2757_v34  ;;  %v2671_v37 = vsel %vm1000_vm3, %v5078_v33, 0.0  ;;  %v2220_v47 = vpop.permute.xlu1 %2219 }
 0xa28   : > { %4266 = vpow2.f32 %v2657_v35  ;;  %2672 = vadd.xlane.f32.xlu0 %v2671_v37  ;;  %4026 = vmatprep.subr.bf16.mxu0 %v4442_v3  ;;  %v2237_v45 = vpack.c.bf16 %v2220_v47, %v2220_v47 }
 0xa2a   : > { %v5084_v38 = vpop.eup %4262  ;;  %v2803_v8 = vsel %vm1468_vm4, %v2237_v45, 0 }
 0xa2b   : > { %v2674_v39 = vsel %vm1000_vm3, %v5084_v38, 0.0 }
 0xa2c   : > { %2675 = vadd.xlane.f32.xlu1 %v2674_v39 }
 0xa2e   : > { %v5088_v40 = vpop.eup %4264 }
 0xa2f   : > { %v2677_v41 = vsel %vm1000_vm3, %v5088_v40, 0.0 }
 0xa30   : > { %2678 = vadd.xlane.f32.xlu1 %v2677_v41 }
 0xa32   : > { %v5092_v42 = vpop.eup %4266 }
 0xa33   : > { %v2680_v43 = vsel %vm1000_vm3, %v5092_v42, 0.0 }
 0xa34   : > { %2681 = vadd.xlane.f32.xlu1 %v2680_v43 }
 0xa3e   : > { %2226 = vrot.lane.b32.xlu0 %v5014_v46, %s4444_s4 }
 0xa42   : > { %2232 = vrot.lane.b32.xlu0 %v5014_v46, %s4445_s26 }
 0xa45   : > { %2229 = vrot.lane.b32.xlu1 %v5014_v46, %s4446_s30 }
 0xa54   : > { %v2661_v44 = vpop.xlane.xlu0 %2660 }
 0xa55   : > { %4268 = vrcp.f32 %v2661_v44 }
 0xa58   : > { %v2223_v50 = vpop.permute.xlu0 %2222 }
 0xa59   : > { %v2238_v55 = vpack.c.bf16 %v2223_v50, %v2223_v50  ;;  %v4208_v50 = vld [vmem:[%s4679_s16 + $0x30] sm:$0xff]  }
 0xa5f   : > { %v4269_v48 = vpop.eup %4268 }
 0xa60   : > { %v2691_v7 = vmul.f32 %v4269_v48, %v5061_v59  ;;  %v2849_v59 = vsel %vm1468_vm4, %v2238_v55, 0  ;;  %v4209_v55 = vld [vmem:[%s4679_s16 + $0x38] sm:$0xff]  }
 0xa62   : > { %v2699_v49 = vpack.c.bf16 %v2691_v7, %v2691_v7 }
 0xa64   : > { %4011 = vmatmul.mubr.msk.bf16.vlgmr.msra.gmra.mrb[60].mxu1 %vm1000_vm3, %v2699_v49 }
 0xa65   : > { %4021 = vmatpush3.bf16.msra.mxu1 %v2803_v8  ;;  %4022 = vmatprep.mubr.msk.bf16.mxu1 %vm4443_vm1, %v4442_v3 }
 0xa66   : > { %4032 = vmatprep.subr.bf16.mxu1 %v4442_v3 }
 0xaa9   : > { %v2664_v51 = vpop.xlane.xlu1 %2663 }
 0xaaa   : > { %4270 = vrcp.f32 %v2664_v51 }
 0xaad   : > { %v2667_v52 = vpop.xlane.xlu0 %2666 }
 0xaae   : > { %4272 = vrcp.f32 %v2667_v52 }
 0xab1   : > { %v2670_v53 = vpop.xlane.xlu1 %2669 }
 0xab2   : > { %4274 = vrcp.f32 %v2670_v53 }
 0xab4   : > { %v4271_v54 = vpop.eup %4270 }
 0xab5   : > { %v2692_v56 = vmul.f32 %v4271_v54, %v5066_v19  ;;  %v2673_v57 = vpop.xlane.xlu0 %2672 }
 0xab6   : > { %4276 = vrcp.f32 %v2673_v57 }
 0xab7   : > { %v2700_v58 = vpack.c.bf16 %v2692_v56, %v2692_v56 }
 0xab8   : > { %v4273_v60 = vpop.eup %4272 }
 0xab9   : > { %v2693_v62 = vmul.f32 %v4273_v60, %v5070_v23  ;;  %4017 = vmatmul.mubr.msk.bf16.vlgmr.msra.gmra.mrb[64].mxu0 %vm1000_vm3, %v2700_v58  ;;  %v2676_v63 = vpop.xlane.xlu1 %2675  ;;  %v2227_v2 = vpop.permute.xlu0 %2226 }
 0xaba   : > { %4027 = vmatpush3.bf16.msra.mxu0 %v2849_v59  ;;  %4278 = vrcp.f32 %v2676_v63  ;;  %4028 = vmatprep.mubr.msk.bf16.mxu0 %vm4443_vm1, %v4442_v3  ;;  %v2240_v9 = vpack.c.bf16 %v2227_v2, %v2227_v2 }
 0xabb   : > { %v2701_v4 = vpack.c.bf16 %v2693_v62, %v2693_v62  ;;  %4038 = vmatprep.subr.bf16.mxu0 %v4442_v3 }
 0xabc   : > { %v4275_v5 = vpop.eup %4274  ;;  %v2941_v19 = vsel %vm1468_vm4, %v2240_v9, 0 }
 0xabd   : > { %v2694_v6 = vmul.f32 %v4275_v5, %v5074_v22  ;;  %4023 = vmatmul.mubr.msk.bf16.vlgmr.msra.gmra.mrb[64].mxu1 %vm1000_vm3, %v2701_v4  ;;  %v2679_v14 = vpop.xlane.xlu1 %2678  ;;  %v2233_v20 = vpop.permute.xlu0 %2232 }
 0xabe   : > { %4033 = vmatpush3.bf16.msra.mxu1 %v2895_v10  ;;  %4280 = vrcp.f32 %v2679_v14  ;;  %4034 = vmatprep.mubr.msk.bf16.mxu1 %vm4443_vm1, %v4442_v3  ;;  %v2242_v24 = vpack.c.bf16 %v2233_v20, %v2233_v20 }
 0xabf   : > { %v2702_v46 = vpack.c.bf16 %v2694_v6, %v2694_v6  ;;  %4044 = vmatprep.subr.bf16.mxu1 %v4442_v3 }
 0xac0   : > { %v4277_v17 = vpop.eup %4276  ;;  %v3033_v36 = vsel %vm1468_vm4, %v2242_v24, 0 }
 0xac1   : > { %v2695_v18 = vmul.f32 %v4277_v17, %v5078_v33  ;;  %4029 = vmatmul.mubr.msk.bf16.vlgmr.msra.gmra.mrb[68].mxu0 %vm1000_vm3, %v2702_v46  ;;  %v2682_v16 = vpop.xlane.xlu1 %2681 }
 0xac2   : > { %4039 = vmatpush3.bf16.msra.mxu0 %v2941_v19  ;;  %4282 = vrcp.f32 %v2682_v16  ;;  %4040 = vmatprep.mubr.msk.bf16.mxu0 %vm4443_vm1, %v4442_v3 }
 0xac3   : > { %v2703_v15 = vpack.c.bf16 %v2695_v18, %v2695_v18  ;;  %4050 = vmatprep.subr.bf16.mxu0 %v4442_v3 }
 0xac4   : > { %v4279_v21 = vpop.eup %4278 }
 0xac5   : > { %v2696_v23 = vmul.f32 %v4279_v21, %v5084_v38  ;;  %4035 = vmatmul.mubr.msk.bf16.vlgmr.msra.gmra.mrb[68].mxu1 %vm1000_vm3, %v2703_v15  ;;  %v2230_v25 = vpop.permute.xlu1 %2229 }
 0xac6   : > { %v2241_v26 = vpack.c.bf16 %v2230_v25, %v2230_v25  ;;  %4046 = vmatprep.mubr.msk.bf16.mxu1 %vm4443_vm1, %v4442_v3 }
 0xac7   : > { %v2704_v27 = vpack.c.bf16 %v2696_v23, %v2696_v23 }
 0xac8   : > { %v4281_v22 = vpop.eup %4280  ;;  %v2987_v28 = vsel %vm1468_vm4, %v2241_v26, 0 }
 0xac9   : > { %v2697_v29 = vmul.f32 %v4281_v22, %v5088_v40  ;;  %4041 = vmatmul.mubr.msk.bf16.vlgmr.msra.gmra.mrb[72].mxu0 %vm1000_vm3, %v2704_v27  ;;  %4045 = vmatpush3.bf16.msra.mxu1 %v2987_v28 }
 0xaca   : > { %4051 = vmatpush3.bf16.msra.mxu0 %v3033_v36  ;;  %4052 = vmatprep.mubr.msk.bf16.mxu0 %vm4443_vm1, %v4442_v3 }
 0xacb   : > { %v2705_v30 = vpack.c.bf16 %v2697_v29, %v2697_v29  ;;  %4056 = vmatprep.subr.bf16.mxu1 %v4442_v3  ;;  %4064 = vmatprep.subr.bf16.mxu0 %v4442_v3  ;;  %v3689_v29 = vld [vmem:[%s4704_s20 + $0x3] ss:$0 sm:$0xff] }
 0xacc   : > { %v4283_v31 = vpop.eup %4282 }
 0xacd   : > { %v2698_v32 = vmul.f32 %v4283_v31, %v5092_v42  ;;  %4047 = vmatmul.mubr.msk.bf16.vlgmr.msra.gmra.mrb[72].mxu1 %vm1000_vm3, %v2705_v30 }
 0xace   : > { %4060 = vmatprep.mubr.msk.bf16.mxu1 %vm4443_vm1, %v4442_v3  ;;  %4057 = vmatpush3.bf16.msra.mxu1 %v4208_v50  ;;  %v4212_v50 = vld [vmem:[%s4725_s12] sm:$0xff]  }
 0xacf   : > { %v2706_v33 = vpack.c.bf16 %v2698_v32, %v2698_v32  ;;  %4058 = vmatprep.subr.bf16.mxu1 %v4442_v3 }
 0xad1   : > { %4053 = vmatmul.mubr.msk.bf16.vlgmr.msra.gmra.mrb[76].mxu0 %vm1000_vm3, %v2706_v33 }
 0xad2   : > { %4068 = vmatprep.mubr.msk.bf16.mxu0 %vm4443_vm1, %v4442_v3  ;;  %4059 = vmatpush3.bf16.msra.mxu1 %v4209_v55 }
 0xad3   : > { %4072 = vmatprep.subr.bf16.mxu1 %v4442_v3 }
 0xb37   : > { %v2747_v34 = vpop.f32.mrb[60].mxu1 }
 0xb38   : > { %v4012_v35 = vpop.f32.mrb[61].mxu1 }
 0xb39   : > { %v2750_v37 = vpop.f32.mrb[62].mxu1 }
 0xb3a   : > { %v4013_v38 = vpop.f32.mrb[63].mxu1 }
 0xb8c   : > { %v2793_v39 = vpop.f32.mrb[64].mxu0 }
 0xb8d   : > { %v4018_v40 = vpop.f32.mrb[65].mxu0 }
 0xb8e   : > { %v2796_v41 = vpop.f32.mrb[66].mxu0 }
 0xb8f   : > { %v4019_v42 = vpop.f32.mrb[67].mxu0 }
 0xb90   : > { %v2839_v43 = vpop.f32.mrb[64].mxu1 }
 0xb91   : > { %v4024_v44 = vpop.f32.mrb[65].mxu1 }
 0xb92   : > { %v2842_v47 = vpop.f32.mrb[66].mxu1 }
 0xb93   : > { %v4025_v48 = vpop.f32.mrb[67].mxu1 }
 0xb94   : > { %v2885_v45 = vpop.f32.mrb[68].mxu0 }
 0xb95   : > { %v4030_v7 = vpop.f32.mrb[69].mxu0 }
 0xb96   : > { %v2888_v49 = vpop.f32.mrb[70].mxu0 }
 0xb97   : > { %v4031_v8 = vpop.f32.mrb[71].mxu0  ;;  %v4210_v49 = vld [vmem:[%s4719_s14] sm:$0xff]  }
 0xb98   : > { %v2931_v51 = vpop.f32.mrb[68].mxu1  ;;  %4065 = vmatpush3.bf16.msra.mxu0 %v4210_v49  ;;  %v4211_v8 = vld [vmem:[%s4719_s14 + $0x8] sm:$0xff]  }
 0xb99   : > { %v4036_v52 = vpop.f32.mrb[69].mxu1  ;;  %4066 = vmatprep.subr.bf16.mxu0 %v4442_v3 }
 0xb9a   : > { %v2934_v53 = vpop.f32.mrb[70].mxu1 }
 0xb9b   : > { %v4037_v54 = vpop.f32.mrb[71].mxu1 }
 0xb9c   : > { %v2977_v56 = vpop.f32.mrb[72].mxu0  ;;  %4067 = vmatpush3.bf16.msra.mxu0 %v4211_v8 }
 0xb9d   : > { %v4178_v57 = vpack.i.bf16 %v2977_v56, %v2793_v39  ;;  %v4042_v58 = vpop.f32.mrb[73].mxu0 }
 0xb9e   : > { %v2980_v60 = vpop.f32.mrb[74].mxu0  ;;  %v709_v58 = vld [vmem:[%s4709_s5] sm:$0x3] }
 0xb9f   : > { %4179 = vrot.lane.b32.xlu1 %v4178_v57, %s4448_s28  ;;  %v4043_v59 = vpop.f32.mrb[75].mxu0 }
 0xba0   : > { %v3023_v62 = vpop.f32.mrb[72].mxu1  ;;  %v5181_v59 = vrot.slane %v709_v58, %v1960_v61  ;;  %v4214_v61 = vld [vmem:[%s4725_s12 + $0x10] sm:$0xff]  }
 0xba1   : > { %v4183_v63 = vpack.i.bf16 %v3023_v62, %v2839_v43  ;;  %v4048_v1 = vpop.f32.mrb[73].mxu1 }
 0xba2   : > { %v3026_v2 = vpop.f32.mrb[74].mxu1  ;;  %v5185_v1 = vrot.slane %v709_v58, %v1966_v0  ;;  %v3693_v0 = vld [vmem:[%s648_s21] ss:$0 sm:$0xff] }
 0xba3   : > { %4184 = vrot.lane.b32.xlu0 %v4183_v63, %s4450_s29  ;;  %v4049_v4 = vpop.f32.mrb[75].mxu1 }
 0xba4   : > { %v3069_v5 = vpop.f32.mrb[76].mxu0 }
 0xba5   : > { %v4188_v6 = vpack.i.bf16 %v3069_v5, %v2885_v45  ;;  %v4054_v9 = vpop.f32.mrb[77].mxu0 }
 0xba6   : > { %v3072_v10 = vpop.f32.mrb[78].mxu0 }
 0xba7   : > { %4189 = vrot.lane.b32.xlu1 %v4188_v6, %s4449_s13  ;;  %v4055_v14 = vpop.f32.mrb[79].mxu0 }
 0xc11   : > { %v4180_v46 = vpop.permute.xlu1 %4179 }
 0xc12   : > { %v4182_v18 = vunpack.i.h.bf16 %v4180_v46  ;;  %v4181_v19 = vunpack.i.l.bf16 %v4180_v46 }
 0xc14   : > { %v3102_v21 = vsel %vm1000_vm3, %v2931_v51, %v4182_v18  ;;  %v3087_v23 = vsel %vm1000_vm3, %v2747_v34, %v4181_v19  ;;  %v4213_v51 = vld [vmem:[%s4725_s12 + $0x8] sm:$0xff]  }
 0xc15   : > { %v4185_v17 = vpop.permute.xlu0 %4184 }
 0xc16   : > { %v4187_v16 = vunpack.i.h.bf16 %v4185_v17  ;;  %v4186_v20 = vunpack.i.l.bf16 %v4185_v17 }
 0xc18   : > { %v3088_v26 = vsel %vm1847_vm6, %v3087_v23, %v4186_v20  ;;  %v3103_v27 = vsel %vm1847_vm6, %v3102_v21, %v4187_v16 }
 0xc19   : > { %v4190_v15 = vpop.permute.xlu1 %4189 }
 0xc1a   : > { %v4192_v24 = vunpack.i.h.bf16 %v4190_v15  ;;  %v4191_v25 = vunpack.i.l.bf16 %v4190_v15 }
 0xc1c   : > { %v3104_v22 = vsel %vm1849_vm7, %v3103_v27, %v4192_v24  ;;  %v3089_v28 = vsel %vm1849_vm7, %v3088_v26, %v4191_v25 }
 0xc1d   : > { %v3105_v36 = vpack.c.bf16 %v3104_v22, %v3089_v28 }
 0xc1f   : > { %4061 = vmatmul.mubr.msk.bf16.vlgmr.msra.gmra.mrb[76].mxu1 %vm747_vm2, %v3105_v36 }
 0xc20   : > { %4080 = vmatprep.mubr.msk.bf16.mxu1 %vm4443_vm1, %v4442_v3  ;;  %4073 = vmatpush3.bf16.msra.mxu1 %v4212_v50 }
 0xc21   : > { %4074 = vmatprep.subr.bf16.mxu1 %v4442_v3 }
 0xc24   : > { %4075 = vmatpush3.bf16.msra.mxu1 %v4213_v51 }
 0xc25   : > { %4076 = vmatprep.subr.bf16.mxu1 %v4442_v3 }
 0xc28   : > { %4077 = vmatpush3.bf16.msra.mxu1 %v4214_v61 }
 0xc29   : > { %4078 = vmatprep.subr.bf16.mxu1 %v4442_v3  ;;  %v3697_v3 = vld [vmem:[%s656_s19] ss:$0 sm:$0xff] }
 0xc2c   : > { %4079 = vmatpush3.bf16.msra.mxu1 %v4215_v11 }
 0xcf2   : > { %v3161_v30 = vpop.f32.mrb[76].mxu1 }
 0xcf3   : > { %v3162_v31 = vadd.f32 %v3689_v29, %v3161_v30  ;;  %v4062_v32 = vpop.f32.mrb[77].mxu1 }
 0xcf4   : > { %v3164_v33 = vpop.f32.mrb[78].mxu1 }
 0xcf5   : > { %v3165_v34 = vadd.f32 %v3689_v29, %v3164_v33  ;;  %v4063_v35 = vpop.f32.mrb[79].mxu1  ;;  %v3168_v37 = vadd.f32 %v3162_v31, %v4969_v12 }
 0xcf7   : > { %v3170_v38 = vsel %vm747_vm2, %v3168_v37, 0.0  ;;  %v3169_v39 = vadd.f32 %v3165_v34, %v4971_v13 }
 0xcf8   : > { %3171 = vadd.xlane.f32.xlu0 %v3170_v38 }
 0xcf9   : > { %v3173_v40 = vsel %vm747_vm2, %v3169_v39, 0.0 }
 0xcfa   : > { %3174 = vadd.xlane.f32.xlu1 %v3173_v40 }
 0xd85   : > { %v3172_v41 = vpop.xlane.xlu0 %3171 }
 0xd86   : > { %v3176_v42 = vmul.f32 0.03125, %v3172_v41 }
 0xd87   : > { %v3175_v43 = vpop.xlane.xlu1 %3174 }
 0xd88   : > { %v3178_v44 = vsub.f32 %v3168_v37, %v3176_v42  ;;  %v3177_v47 = vmul.f32 0.03125, %v3175_v43 }
 0xd8a   : > { %v3179_v48 = vsub.f32 %v3169_v39, %v3177_v47  ;;  %v3180_v45 = vmul.f32 %v3178_v44, %v3178_v44 }
 0xd8c   : > { %v3182_v12 = vsel %vm747_vm2, %v3180_v45, 0.0  ;;  %v3181_v7 = vmul.f32 %v3179_v48, %v3179_v48 }
 0xd8d   : > { %3183 = vadd.xlane.f32.xlu0 %v3182_v12 }
 0xd8e   : > { %v3185_v13 = vsel %vm747_vm2, %v3181_v7, 0.0 }
 0xd91   : > { %3186 = vadd.xlane.f32.xlu0 %v3185_v13 }
 0xe1a   : > { %v3184_v52 = vpop.xlane.xlu0 %3183 }
 0xe1b   : > { %v3188_v53 = vmul.f32 0.03125, %v3184_v52 }
 0xe1d   : > { %v3190_v54 = vadd.f32 1e-05, %v3188_v53 }
 0xe1e   : > { %v3187_v55 = vpop.xlane.xlu0 %3186 }
 0xe1f   : > { %4284 = vrsqrt.f32 %v3190_v54  ;;  %v3189_v56 = vmul.f32 0.03125, %v3187_v55 }
 0xe21   : > { %v3191_v57 = vadd.f32 1e-05, %v3189_v56 }
 0xe23   : > { %4286 = vrsqrt.f32 %v3191_v57 }
 0xe29   : > { %v4285_v60 = vpop.eup %4284 }
 0xe2a   : > { %v3194_v62 = vmul.f32 %v4285_v60, %v3178_v44 }
 0xe2c   : > { %v3200_v2 = vmul.f32 %v5181_v59, %v3194_v62 }
 0xe2d   : > { %v4287_v63 = vpop.eup %4286 }
 0xe2e   : > { %v3195_v4 = vmul.f32 %v4287_v63, %v3179_v48  ;;  %v3206_v6 = vadd.f32 %v5185_v1, %v3200_v2 }
 0xe30   : > { %v3201_v5 = vmul.f32 %v5181_v59, %v3195_v4 }
 0xe32   : > { %v3207_v9 = vadd.f32 %v5185_v1, %v3201_v5 }
 0xe34   : > { %v3208_v10 = vpack.c.bf16 %v3207_v9, %v3206_v6 }
 0xe36   : > { %4069 = vmatmul.mubr.msk.bf16.vlgmr.msra.gmra.mrb[80].mxu0 %vm747_vm2, %v3208_v10 }
 0xf09   : > { %v3264_v14 = vpop.f32.mrb[80].mxu0 }
 0xf0a   : > { %v3265_v46 = vadd.f32 %v3693_v0, %v3264_v14  ;;  %v4070_v17 = vpop.f32.mrb[81].mxu0 }
 0xf0b   : > { %v3267_v18 = vpop.f32.mrb[82].mxu0 }
 0xf0c   : > { %v3268_v19 = vadd.f32 %v3693_v0, %v3267_v18  ;;  %v4071_v16 = vpop.f32.mrb[83].mxu0  ;;  %v3271_v20 = vmax.f32 %v3265_v46, 0.0 }
 0xf0e   : > { %v3272_v15 = vmax.f32 %v3268_v19, 0.0 }
 0xf10   : > { %v3273_v21 = vpack.c.bf16 %v3272_v15, %v3271_v20 }
 0xf12   : > { %4081 = vmatmul.mubr.msk.bf16.vlgmr.msra.gmra.mrb[80].mxu1 %vm3304_vm8, %v3273_v21 }
 0xfe5   : > { %v3342_v23 = vpop.f32.mrb[80].mxu1 }
 0xfe6   : > { %v3343_v24 = vadd.f32 %v3697_v3, %v3342_v23  ;;  %v4082_v25 = vpop.f32.mrb[81].mxu1 }
 0xfe7   : > { %v3345_v26 = vpop.f32.mrb[82].mxu1 }
 0xfe8   : > { %v3346_v27 = vadd.f32 %v3697_v3, %v3345_v26  ;;  %v4083_v22 = vpop.f32.mrb[83].mxu1  ;;  %v3349_v28 = vadd.f32 %v3343_v24, %v3206_v6 }
 0xfea   : > { %v3351_v36 = vsel %vm747_vm2, %v3349_v28, 0.0  ;;  %v3350_v29 = vadd.f32 %v3346_v27, %v3207_v9 }
 0xfeb   : > { %3352 = vadd.xlane.f32.xlu1 %v3351_v36 }
 0xfec   : > { %v3354_v30 = vsel %vm747_vm2, %v3350_v29, 0.0 }
 0xfed   : > { %3355 = vadd.xlane.f32.xlu0 %v3354_v30 }
0x1078   : > { %v3353_v31 = vpop.xlane.xlu1 %3352 }
0x1079   : > { %v3357_v32 = vmul.f32 0.03125, %v3353_v31 }
0x107a   : > { %v3356_v33 = vpop.xlane.xlu0 %3355 }
0x107b   : > { %v3359_v34 = vsub.f32 %v3349_v28, %v3357_v32  ;;  %v3358_v35 = vmul.f32 0.03125, %v3356_v33 }
0x107d   : > { %v3360_v37 = vsub.f32 %v3350_v29, %v3358_v35  ;;  %v3361_v38 = vmul.f32 %v3359_v34, %v3359_v34 }
0x107f   : > { %v3363_v39 = vsel %vm747_vm2, %v3361_v38, 0.0  ;;  %v3362_v40 = vmul.f32 %v3360_v37, %v3360_v37 }
0x1080   : > { %3364 = vadd.xlane.f32.xlu1 %v3363_v39 }
0x1081   : > { %v3366_v41 = vsel %vm747_vm2, %v3362_v40, 0.0 }
0x1082   : > { %3367 = vadd.xlane.f32.xlu0 %v3366_v41 }
0x110d   : > { %v3365_v42 = vpop.xlane.xlu1 %3364 }
0x110e   : > { %v3369_v43 = vmul.f32 0.03125, %v3365_v42 }
0x110f   : > { %v3368_v44 = vpop.xlane.xlu0 %3367 }
0x1110   : > { %v3371_v47 = vadd.f32 1e-05, %v3369_v43  ;;  %v3370_v48 = vmul.f32 0.03125, %v3368_v44 }
0x1112   : > { %4288 = vrsqrt.f32 %v3371_v47  ;;  %v3372_v45 = vadd.f32 1e-05, %v3370_v48 }
0x1114   : > { %4290 = vrsqrt.f32 %v3372_v45 }
0x111c   : > { %v4289_v12 = vpop.eup %4288 }
0x111d   : > { %v3375_v7 = vmul.f32 %v4289_v12, %v3359_v34 }
0x111e   : > { %v4291_v13 = vpop.eup %4290 }
0x111f   : > { %v3377_v49 = vmul.f32 %v3375_v7, %v5181_v59  ;;  %v3376_v8 = vmul.f32 %v4291_v13, %v3360_v37  ;;  %3386 = sbr.rel (%p3703_p4) target bundleno = 4390 (0x1126), region = 84 }
0x1121   : > { %v3379_v50 = vadd.f32 %v3377_v49, %v5185_v1  ;;  %v3378_v51 = vmul.f32 %v3376_v8, %v5181_v59 }
0x1123   : > { %3381 = vst.msk [vmem:[#allocation2] sm:$0xff] %vm747_vm2, %v3379_v50  ;;  %v3380_v52 = vadd.f32 %v3378_v51, %v5185_v1  ;;  %3387 = vst.msk [vmem:[#allocation8] sm:$0xff] (!%p3703_p4), %vm747_vm2, %v3379_v50 }
0x1125   : > { %3382 = vst.msk [vmem:[#allocation2 + $0x8] sm:$0xff] %vm747_vm2, %v3380_v52  ;;  %3388 = vst.msk [vmem:[#allocation8 + $0x8] sm:$0xff] (!%p3703_p4), %vm747_vm2, %v3380_v52 }
0x1126 PF: > { %s5313_s2 = sld [smem:[#allocation15_spill]]  ;;  %s4451_s12 = smov [#allocation8]  }
0x1127   : > { %s3398_s17 = sshll.u32 %s4451_s12, 4  ;;  %s3399_s17 = int_to_ptr.vmem [resolvable:$true] %s3398_s17 }
0x1128   : > { %s4352_s19 = scalar_lea.vmem %s3399_s17, 256  ;;  %p4359_p3 = scmp.lt.s32.totalorder %s3399_s17, %s3399_s17 }
0x1129   : > { %p4353_p1 = scmp.ne.s32.totalorder %s3399_s17, %s4352_s19  ;;  %p4360_p5 = scmp.lt.s32.totalorder %s4352_s19, %s4352_s19 }
0x112b   : > { %p4361_p6 = por %p4360_p5, %p4359_p3 }
0x112c   : > { %s5314_s21 = sadd.s32 4294967295, %s5313_s2  }
0x112d   : > { %p5220_p8 = scmp.eq.s32.totalorder %s5314_s21, 1 }
0x112f   : > { %p4354_p2 = pnand %p4353_p1, %p5220_p8 }
0x1131   : > { %p4355_p13 = pneg %p4354_p2 }
0x1133   : > { %p4362_p10 = pnand %p4361_p6, %p4355_p13 }
0x1135   : > { %4365 = shalt.err (!%p4362_p10)
}
0x1136   : > { %s5316_s27 = sld [smem:[#allocation22_spill]] }
0x113c   : > { %s4366_s3 = scalar_lea.hbm %s5316_s27, 256 }
0x113d   : > { %p4367_p12 = scmp.ne.s32.totalorder %s5316_s27, %s4366_s3  ;;  %p4372_p9 = scmp.lt.u32.totalorder %s4366_s3, %s5316_s27 }
0x113f   : > { %p4368_p0 = pnand %p4367_p12, %p5220_p8 }
0x1141   : > { %p4369_p7 = pneg %p4368_p0 }
0x1143   : > { %p4374_p11 = pnand %p4372_p9, %p4369_p7 }
0x1145   : > { %4377 = shalt.err (!%p4374_p11)
}
0x1146   : > { %s4452_s13 = smov 128  }
0x1147   : > { %4089 = dma.vmem_to_hbm [thread:$0]  (%p5220_p8), %s3399_s17, 256, %s5316_s27, [#allocation5], %s4452_s13, %s4452_s13, %s4448_s28  }
0x1148   : > { %4411 = dma.done.wait (%p5220_p8), [#allocation5], 256  }
0x1149   : > { %4413 = vsyncadd (%p5220_p8), [#allocation5], 4294967040 }
0x114a PF: > { %s5317_s15 = sld [smem:[#allocation15_spill]]  ;;  %s5318_s21 = sld [smem:[#allocation12_spill]] }
0x114b   : > { %s5319_s22 = sld [smem:[#allocation13_spill]]  ;;  %s5320_s23 = sld [smem:[#allocation17_spill]] }
0x114c   : > { %s5321_s24 = sld [smem:[#allocation14_spill]]  ;;  %s5322_s25 = sld [smem:[#allocation16_spill]] }
0x1150   : > { %s29_s26 = sadd.s32 1, %s5317_s15  }
0x1151   : > { %p26_p4 = scmp.ge.s32.totalorder %s29_s26, 4  }
0x1153   :  { %28 = sbr.rel (!%p26_p4) target bundleno = 13 (0xd), region = 157 }
0x115a   :  { %3414 = vsyncpa [#allocation4], 1 }
0x115b   :  { %3416 = vsyncpa [#allocation4 + $0x1], 1 }
0x115c   :  { %3417 = vsyncpa [#allocation7], 1 }
0x115d   :  { %3419 = vsyncpa [#allocation7 + $0x1], 1 }
0x115e   :  { %3420 = vsyncpa [#allocation5], 1 }
0x115f   :  { %3422 = vsyncpa [#allocation5 + $0x1], 1 }

</bundles_post_ra>
